<compile_context>
chip_gen: v5e
topology: v5e:2x2
jax: 0.10.0
libtpu: 0.0.40
codegen_flags: <defaults>
</compile_context>

<pallas_src>
import math
from functools import partial

import jax
import jax.numpy as jnp
from jax import lax
from jax.experimental import pallas as pl
from jax.experimental.pallas import tpu as pltpu


def _softplus(x):
    # numerically-stable log(1 + exp(x)) == max(x, 0) + log1p(exp(-|x|))
    return jnp.maximum(x, 0.0) + jnp.log1p(jnp.exp(-jnp.abs(x)))


def _default_core_splits():
    # 2-way grid split only pays on multi-TensorCore chips (v7x); it is pure overhead
    # (extra masked tiles + wrapper reduce) on 1-TC parts (v5e / v6e).
    try:
        kind = jax.devices()[0].device_kind.lower()
    except Exception:
        return 1
    return 2 if "v7" in kind else 1


# ---------------------------------------------------------------------------
# Phase 1: streaming per-core column sums of `features`  (N, F) -> (cores*8, F)
# ---------------------------------------------------------------------------
def _colsum_kernel(f_ref, out_ref, acc_ref, *, n_rows):
    c = pl.program_id(0)
    j = pl.program_id(1)
    tm = f_ref.shape[0]

    @pl.when(j == 0)
    def _init():
        acc_ref[...] = jnp.zeros_like(acc_ref)

    # Logical (unclamped) row ids of this tile: masks the ragged last tile and any
    # duplicated (clamped) overhang tile from the core split.
    row0 = (c * pl.num_programs(1) + j) * tm
    rows = row0 + lax.broadcasted_iota(jnp.int32, (tm, 1), 0)

    f = f_ref[...].astype(jnp.float32)                       # (tm, F)
    # where-select, NOT a multiplicative mask: out-of-range rows can hold stale VMEM
    # garbage (NaN/Inf) and 0 * NaN = NaN.
    f = jnp.where(rows < n_rows, f, 0.0)
    acc_ref[...] += jnp.sum(f, axis=0, keepdims=True)        # (1, F)

    @pl.when(j == pl.num_programs(1) - 1)
    def _fin():
        out_ref[...] = jnp.broadcast_to(acc_ref[...], out_ref.shape)


# ---------------------------------------------------------------------------
# Phase 2: streaming logits (row . v on the MXU) + masked softplus partial sums
# ---------------------------------------------------------------------------
def _loss_sum_kernel(f_ref, fp_ref, v_ref, out_ref, acc_ref, *, n_rows):
    c = pl.program_id(0)
    j = pl.program_id(1)
    tm = f_ref.shape[0]

    @pl.when(j == 0)
    def _init():
        acc_ref[...] = jnp.zeros_like(acc_ref)

    v = v_ref[...].astype(jnp.float32)                       # (F, 1)
    f = f_ref[...].astype(jnp.float32)                       # (tm, F)
    fp = fp_ref[...].astype(jnp.float32)                     # (tm, F)

    # row . v as a 1-column matmul: the MXU slot is otherwise idle in this phase and
    # this keeps the (only 2-unit) XLU lane-reduce off the per-row critical path.
    pos_logits = jnp.dot(f, v, preferred_element_type=jnp.float32)    # (tm, 1)
    neg_logits = jnp.dot(fp, v, preferred_element_type=jnp.float32)   # (tm, 1)

    # BCEWithLogits(x, 1) = softplus(-x) ; BCEWithLogits(x, 0) = softplus(x)
    per_row = _softplus(-pos_logits) + _softplus(neg_logits)          # (tm, 1)

    # Each mat-vec output row depends only on its own (possibly garbage) input row, so
    # a where-select on the per-row loss is garbage-safe for the unmasked tile loads.
    row0 = (c * pl.num_programs(1) + j) * tm
    rows = row0 + lax.broadcasted_iota(jnp.int32, (tm, 1), 0)
    per_row = jnp.where(rows < n_rows, per_row, 0.0)

    acc_ref[...] += jnp.sum(per_row, axis=0, keepdims=True)           # (1, 1)

    @pl.when(j == pl.num_programs(1) - 1)
    def _fin():
        out_ref[...] = jnp.broadcast_to(acc_ref[...], out_ref.shape)


# ---------------------------------------------------------------------------
# Wrapper
# ---------------------------------------------------------------------------
def dgilc_forward(features, features_perm, w_enc, w_disc, *,
                  block_rows=1024, n_core_splits=None):
    """DGILC forward loss (float32 scalar). Features may be f32 or bf16."""
    n, f_dim = features.shape
    assert features_perm.shape == (n, f_dim)
    f2, h = w_enc.shape
    assert f2 == f_dim and w_disc.shape == (h, h)

    if n_core_splits is None:
        n_core_splits = _default_core_splits()
    n_core_splits = max(1, int(n_core_splits))

    itemsize = jnp.dtype(features.dtype).itemsize

    # Row tile: large enough to amortize the ~0.35 us per-grid-step overhead, capped so
    # phase 2's streams (2 inputs x 2 pipeline buffers) stay well inside scoped VMEM.
    tile_bytes_cap = 4 * 1024 * 1024
    tm_cap = max(8, (tile_bytes_cap // max(1, f_dim * itemsize)) // 8 * 8)
    tm = min(block_rows, tm_cap)
    if n <= tm:
        tm = n                       # single tile: block == full array extent (allowed)
    else:
        tm = max(8, (tm // 8) * 8)

    n_tiles = pl.cdiv(n, tm)
    tiles_per_core = pl.cdiv(n_tiles, n_core_splits)

    # No wrapper-side padding of the (N, F) streams.  If the core split does not divide
    # the tile count, the overhanging tiles re-read the last real tile (clamped DMA) and
    # are fully masked in-kernel via their unclamped logical row ids.
    if n_core_splits * tiles_per_core == n_tiles:
        def row_map(c, j):
            return (c * tiles_per_core + j, 0)
    else:
        last_tile = n_tiles - 1

        def row_map(c, j):
            return (jnp.minimum(c * tiles_per_core + j, last_tile), 0)

    cp = pltpu.CompilerParams(
        dimension_semantics=("parallel", "arbitrary"),
        vmem_limit_bytes=32 * 1024 * 1024,
    )

    # -------- Phase 1: per-core column sums --------
    parts1 = pl.pallas_call(
        partial(_colsum_kernel, n_rows=n),
        out_shape=jax.ShapeDtypeStruct((n_core_splits * 8, f_dim), jnp.float32),
        grid_spec=pltpu.PrefetchScalarGridSpec(
            num_scalar_prefetch=0,
            grid=(n_core_splits, tiles_per_core),
            in_specs=[pl.BlockSpec((tm, f_dim), row_map)],
            out_specs=pl.BlockSpec((8, f_dim), lambda c, j: (c, 0)),
            scratch_shapes=[pltpu.VMEM((1, f_dim), jnp.float32)],
        ),
        compiler_params=cp,
        cost_estimate=pl.CostEstimate(
            flops=int(2 * n * f_dim),
            transcendentals=0,
            bytes_accessed=int(n * f_dim * itemsize + n_core_splits * 8 * f_dim * 4),
        ),
    )(features)

    # -------- Fold: summary -> discriminator -> per-row projection vector v --------
    # Tiny O(F*H) work done as plain XLA between the two streaming kernels, so
    # W_enc / W_disc never sit (double-buffered) in VMEM during the streams.
    hp = lax.Precision.HIGHEST
    colsum = jnp.sum(parts1[::8, :], axis=0)                      # (F,)  row 0 per core
    mean_f = colsum * (1.0 / n)
    we = w_enc.astype(jnp.float32)
    wd = w_disc.astype(jnp.float32)
    # summary = sigmoid(mean(f @ We, 0)) == sigmoid(mean(f, 0) @ We)   (linear encoder)
    summary = jax.nn.sigmoid(jnp.dot(mean_f, we, precision=hp))   # (H,)
    ws = jnp.dot(wd, summary, precision=hp)                       # (H,)
    v_col = jnp.dot(we, ws, precision=hp).reshape(f_dim, 1)       # (F, 1): logit = x . v

    # -------- Phase 2: streaming masked softplus partial sums --------
    # TODO(synk): with the linear stand-in encoder the `features_perm` stream is a pure
    # row-permutation of the pos logits and could be dropped (halving HBM traffic), but
    # it is kept so the structure survives a real (non-linear) graph encoder.
    parts2 = pl.pallas_call(
        partial(_loss_sum_kernel, n_rows=n),
        out_shape=jax.ShapeDtypeStruct((n_core_splits * 8, 128), jnp.float32),
        grid_spec=pltpu.PrefetchScalarGridSpec(
            num_scalar_prefetch=0,
            grid=(n_core_splits, tiles_per_core),
            in_specs=[
                pl.BlockSpec((tm, f_dim), row_map),
                pl.BlockSpec((tm, f_dim), row_map),
                pl.BlockSpec((f_dim, 1), lambda c, j: (0, 0)),
            ],
            out_specs=pl.BlockSpec((8, 128), lambda c, j: (c, 0)),
            scratch_shapes=[pltpu.VMEM((1, 1), jnp.float32)],
        ),
        compiler_params=cp,
        cost_estimate=pl.CostEstimate(
            flops=int(4 * n * f_dim + 12 * n),
            transcendentals=int(4 * n),
            bytes_accessed=int(2 * n * f_dim * itemsize + f_dim * 4
                               + n_core_splits * 8 * 128 * 4),
        ),
    )(features, features_perm, v_col)

    per_core = parts2[::8, 0]
    return jnp.sum(per_core) / jnp.float32(n)


if __name__ == "__main__":
    # Small synthetic graph: N nodes, F input features, H hidden units.
    N, F_DIM, H = 3000, 128, 128

    key = jax.random.PRNGKey(0)
    k_feat, k_enc, k_disc, k_perm = jax.random.split(key, 4)

    features = jax.random.normal(k_feat, (N, F_DIM), dtype=jnp.float32)

    # Stand-in linear encoder weight (deterministic).
    w_enc = jax.random.uniform(
        k_enc, (F_DIM, H), dtype=jnp.float32,
        minval=-1.0 / math.sqrt(F_DIM), maxval=1.0 / math.sqrt(F_DIM))

    # Discriminator.reset_parameters(): uniform(-1/sqrt(H), 1/sqrt(H)).
    w_disc = jax.random.uniform(
        k_disc, (H, H), dtype=jnp.float32,
        minval=-1.0 / math.sqrt(H), maxval=1.0 / math.sqrt(H))

    # torch.randperm(graph.number_of_nodes()) -> deterministic JAX permutation (glue).
    perm = jax.random.permutation(k_perm, N)
    features_perm = features[perm]

    # Pure-JAX reference of the exact (unfolded) module math.
    hp = lax.Precision.HIGHEST
    pos = jnp.dot(features, w_enc, precision=hp)
    neg = jnp.dot(features_perm, w_enc, precision=hp)
    summary = jax.nn.sigmoid(jnp.mean(pos, axis=0))
    ws = jnp.dot(w_disc, summary, precision=hp)
    ref = (jnp.mean(_softplus(-jnp.dot(pos, ws, precision=hp)))
           + jnp.mean(_softplus(jnp.dot(neg, ws, precision=hp))))

    # Default config: auto core split for the local chip, ragged (masked) last tile.
    loss = dgilc_forward(features, features_perm, w_enc, w_disc)
    loss = jax.block_until_ready(loss)
    assert loss.shape == () and bool(jnp.isfinite(loss))
    assert bool(jnp.allclose(loss, ref, rtol=1e-3, atol=1e-3)), (float(loss), float(ref))

    # Forced 2-way core split with an odd tile count: exercises the clamped
    # (duplicated, fully-masked) overhang tile plus the ragged last tile.
    loss2 = dgilc_forward(features, features_perm, w_enc, w_disc,
                          block_rows=1024, n_core_splits=2)
    loss2 = jax.block_until_ready(loss2)
    assert bool(jnp.allclose(loss2, ref, rtol=1e-3, atol=1e-3)), (float(loss2), float(ref))

    print("KERNEL_OK")
</pallas_src>

<mosaic_0001>
module attributes {stable_mosaic.version = 11 : i64} {
  func.func @_colsum_kernel(%arg0: i32, %arg1: i32, %arg2: memref<1024x128xf32, #tpu.memory_space<vmem>>, %arg3: memref<8x128xf32, #tpu.memory_space<vmem>>, %arg4: memref<1x128xf32, #tpu.memory_space<vmem>>) attributes {dimension_semantics = [#tpu.dimension_semantics<parallel>, #tpu.dimension_semantics<arbitrary>], iteration_bounds = array<i64: 1, 3>, scalar_prefetch = 0 : i64, scratch_operands = 1 : i64, tpu.core_type = #tpu.core_type<tc>, window_params = [{transform_indices = @transform_0, window_bounds = array<i64: 1024, 128>}, {transform_indices = @transform_1, window_bounds = array<i64: 8, 128>}]} {
    %c0_i32 = arith.constant 0 : i32
    %0 = arith.cmpi eq, %arg1, %c0_i32 : i32
    %1 = arith.extui %0 : i1 to i32
    %c0_i32_0 = arith.constant 0 : i32
    %2 = arith.cmpi ne, %1, %c0_i32_0 : i32
    scf.if %2 {
      %cst_8 = arith.constant 0.000000e+00 : f32
      %24 = vector.broadcast %cst_8 : f32 to vector<1x128xf32>
      %c0_9 = arith.constant 0 : index
      %c0_10 = arith.constant 0 : index
      %25 = vector.load %arg4[%c0_9, %c0_10] : memref<1x128xf32, #tpu.memory_space<vmem>>, vector<1x128xf32>
      tpu.vector_store %arg4[%c0_9, %c0_10], %24 {strides = array<i32>} : memref<1x128xf32, #tpu.memory_space<vmem>>, vector<1x128xf32>,
    } else {
    }
    %c3_i32 = arith.constant 3 : i32
    %3 = arith.muli %arg0, %c3_i32 : i32
    %4 = arith.addi %3, %arg1 : i32
    %c1024_i32 = arith.constant 1024 : i32
    %5 = arith.muli %4, %c1024_i32 : i32
    %6 = tpu.iota {dimensions = array<i32: 0>} : vector<1024x1xi32>
    %7 = vector.broadcast %5 : i32 to vector<1024x1xi32>
    %8 = arith.addi %7, %6 : vector<1024x1xi32>
    %c0 = arith.constant 0 : index
    %c0_1 = arith.constant 0 : index
    %9 = vector.load %arg2[%c0, %c0_1] : memref<1024x128xf32, #tpu.memory_space<vmem>>, vector<1024x128xf32>
    %c3000_i32 = arith.constant 3000 : i32
    %10 = vector.broadcast %c3000_i32 : i32 to vector<1024x1xi32>
    %11 = arith.cmpi slt, %8, %10 : vector<1024x1xi32>
    %cst = arith.constant 0.000000e+00 : f32
    %12 = vector.shape_cast %11 : vector<1024x1xi1> to vector<1024x1xi1>
    %13 = vector.broadcast %12 : vector<1024x1xi1> to vector<1024x128xi1>
    %14 = vector.broadcast %cst : f32 to vector<1024x128xf32>
    %15 = arith.select %13, %9, %14 : vector<1024x128xi1>, vector<1024x128xf32>
    %c0_2 = arith.constant 0 : index
    %c0_3 = arith.constant 0 : index
    %16 = vector.load %arg4[%c0_2, %c0_3] : memref<1x128xf32, #tpu.memory_space<vmem>>, vector<1x128xf32>
    %cst_4 = arith.constant dense<0.000000e+00> : vector<128xf32>
    %17 = vector.multi_reduction <add>, %15, %cst_4 [0] : vector<1024x128xf32> to vector<128xf32>
    %18 = vector.shape_cast %17 : vector<128xf32> to vector<1x128xf32>
    %19 = arith.addf %16, %18 : vector<1x128xf32>
    %c0_5 = arith.constant 0 : index
    %c0_6 = arith.constant 0 : index
    %20 = vector.load %arg4[%c0_5, %c0_6] : memref<1x128xf32, #tpu.memory_space<vmem>>, vector<1x128xf32>
    tpu.vector_store %arg4[%c0_5, %c0_6], %19 {strides = array<i32>} : memref<1x128xf32, #tpu.memory_space<vmem>>, vector<1x128xf32>,
    %c2_i32 = arith.constant 2 : i32
    %21 = arith.cmpi eq, %arg1, %c2_i32 : i32
    %22 = arith.extui %21 : i1 to i32
    %c0_i32_7 = arith.constant 0 : i32
    %23 = arith.cmpi ne, %22, %c0_i32_7 : i32
    scf.if %23 {
      %c0_8 = arith.constant 0 : index
      %c0_9 = arith.constant 0 : index
      %24 = vector.load %arg4[%c0_8, %c0_9] : memref<1x128xf32, #tpu.memory_space<vmem>>, vector<1x128xf32>
      %25 = vector.shape_cast %24 : vector<1x128xf32> to vector<1x128xf32>
      %26 = vector.broadcast %25 : vector<1x128xf32> to vector<8x128xf32>
      %c0_10 = arith.constant 0 : index
      %c0_11 = arith.constant 0 : index
      %27 = vector.load %arg3[%c0_10, %c0_11] : memref<8x128xf32, #tpu.memory_space<vmem>>, vector<8x128xf32>
      tpu.vector_store %arg3[%c0_10, %c0_11], %26 {strides = array<i32>} : memref<8x128xf32, #tpu.memory_space<vmem>>, vector<8x128xf32>,
    } else {
    }
    return
  }
  func.func @transform_0(%arg0: i32, %arg1: i32) -> (i32, i32) {
    %c3_i32 = arith.constant 3 : i32
    %0 = arith.muli %arg0, %c3_i32 : i32
    %1 = arith.addi %0, %arg1 : i32
    %c0_i32 = arith.constant 0 : i32
    %c0_i32_0 = arith.constant 0 : i32
    return %1, %c0_i32 : i32, i32
  }
  func.func @transform_1(%arg0: i32, %arg1: i32) -> (i32, i32) {
    %c0_i32 = arith.constant 0 : i32
    %c0_i32_0 = arith.constant 0 : i32
    return %arg0, %c0_i32 : i32, i32
  }
}

</mosaic_0001>

<bundles_post_ra>
// kernel: tpu_custom_call.1
= control target key start
LH: loop header
LB: loop body
LE: loop exit
PB: predicated region body
PF: predicated region fallthrough
CT: control target
= control target key end

     0   :  { %6 = vsyncpa [#allocation4], 0  ;;  %s2589_s0 = inlined_call_operand.hbm [shape: f32[3000,128], index: 0, kind: input, shape index: {}]   ;;  %s2590_s1 = inlined_call_operand.hbm [shape: f32[8,128], index: 1, kind: output, shape index: {}]  }
   0x1   :  { %8 = vsyncpa [#allocation4 + $0x1], 0 }
   0x2   :  { %9 = vsyncpa [#allocation5], 0  ;;  %s1505_s6 = smov 0   ;;  %s1507_s7 = smov 0  }
   0x3   :  { %s1509_s8 = smov 0   ;;  %s1511_s9 = smov 0  }
   0x4   :  { %s1513_s10 = smov 0   ;;  %s1515_s11 = smov 0  }
   0x5 LB: > { %s1287_s12 = sadd.s32 4294967295, %s1488_s11   ;;  %s24_s13 = sadd.s32 1, %s1484_s10  ;;  %s1488_s11 = sphi %s1515_s11, %s15_s11   ;;  %s1484_s10 = sphi %s1513_s10, %s2783_s10   ;;  %s1480_s9 = sphi %s1511_s9, %s2782_s9   ;;  %s1476_s8 = sphi %s1509_s8, %s2781_s8   ;;  %s1472_s7 = sphi %s1507_s7, %s2780_s7   ;;  %s1468_s6 = sphi %s1505_s6, %s2779_s6  }
   0x6   : > { %p25_p0 = scmp.ge.s32.totalorder %s24_s13, 3  ;;  %s38_s14 = sadd.s32 1, %s1476_s8 }
   0x7   : > { %p45_p1 = scmp.ne.s32.totalorder %s1476_s8, %s1472_s7  ;;  %p46_p2 = scmp.eq.s32.totalorder %s1488_s11, 0 }
   0x8   : > { %s2785_s13 = smov (%p25_p0, %s24_s13), 0  ;;  %p51_p4 = scmp.ne.s32.totalorder %s1472_s7, %s1468_s6 }
   0x9   : > { %p47_p3 = por %p46_p2, %p45_p1  ;;  %s35_s15 = ssub.s32 %s1484_s10, %s2785_s13 }
   0xa   : > { %p52_p5 = scmp.eq.s32.totalorder %s1287_s12, 0  ;;  %p36_p6 = scmp.eq.s32.totalorder %s35_s15, 0 }
   0xb   : > { %p1289_p8 = scmp.ge.s32.totalorder %s1488_s11, 3 }
   0xc   : > { %p1546_p7 = por %p52_p5, %p51_p4 }
   0xd   : > { %s1551_s17 = scalar_select %p36_p6, %s1476_s8, %s38_s14  }
   0xe   : > { %97 = sbr.rel (%p1289_p8) target bundleno = 55 (0x37), region = 16 }
  0x13   : > { %100 = sbr.rel (!%p47_p3) target bundleno = 55 (0x37), region = 20  ;;  %s101_s18 = sand.u32 (%p47_p3), 1, %s1476_s8  }
  0x14   : > { %s1291_s19 = sshll.u32 (%p47_p3), %s1484_s10, 7  ;;  %s1290_s20 = sshll.u32 (%p47_p3), %s101_s18, 10 }
  0x15   : > { %s109_s21 = ssub.s32 (%p47_p3), 375, %s1291_s19  ;;  %s1559_s25 = scalar_lea.sflag (%p47_p3), [#allocation4], %s101_s18 }
  0x16   : > { %p110_p9 = scmp.lt.s32.totalorder (%p47_p3), %s109_s21, 128  ;;  %s105_s26 = scalar_lea.vmem (%p47_p3), [#allocation3], %s1290_s20 }
  0x18   : > { %s2787_s21 = smov (!%p110_p9, %s109_s21), 128 }
  0x19   : > { %s1292_s22 = sshll.u32 %s2787_s21, 3 }
  0x1a   : > { %s113_s23 = ssub.s32 1024, %s1292_s22 }
  0x1b   : > { %s114_s24 = sshll.u32 %s113_s23, 4 }
  0x1c   : > { %115 = vsyncadd %s1559_s25, %s114_s24  ;;  %p1562_p10 = scmp.ne.s32.totalorder %s1292_s22, 0  ;;  %s1306_s28 = sshll.u32 %s1484_s10, 10 }
  0x1d   : > { %s118_s2 = scalar_lea.hbm %s2589_s0, %s1306_s28  ;;  %s1570_s3 = sshll.u32 %s105_s26, 4  ;;  %s123_s3 = int_to_ptr.vmem [resolvable:$true] %s1570_s3 }
  0x1e   : > { %s120_s4 = sshll.u32 %s118_s2, 4  ;;  %s1296_s5 = sshll.u32 %s2787_s21, 7  ;;  %s1573_s4 = int_to_ptr.hbm [resolvable:$true] %s120_s4 }
  0x1f   : > { %s1367_s6 = sshra.s32 %s1573_s4, 4  ;;  %s1369_s14 = sshrl.u32 %s1296_s5, 4  ;;  %s1368_s6 = int_to_ptr.hbm [resolvable:$true] %s1367_s6 }
  0x20   : > { %s1374_s15 = scalar_lea.hbm %s1368_s6, %s1369_s14  ;;  %s1378_s20 = scalar_lea.hbm %s2589_s0, 3000 }
  0x21   : > { %p1375_p11 = scmp.ne.s32.totalorder %s1368_s6, %s1374_s15  ;;  %p1380_p0 = scmp.lt.s32.totalorder %s1378_s20, %s1374_s15 }
  0x23   : > { %p1376_p12 = pnand %p1375_p11, %p1562_p10 }
  0x25   : > { %p1377_p13 = pneg %p1376_p12 }
  0x27   : > { %p1382_p1 = pnand %p1380_p0, %p1377_p13 }
  0x29   : > { %1385 = shalt.err (!%p1382_p1)
}
  0x2a   : > { %s1386_s22 = sshra.s32 %s123_s3, 4  ;;  %s1490_s24 = smov [#allocation3]   ;;  %s1387_s22 = int_to_ptr.vmem [resolvable:$true] %s1386_s22 }
  0x2b   : > { %s1393_s23 = scalar_lea.vmem %s1387_s22, %s1369_s14  ;;  %s1397_s26 = scalar_lea.vmem %s1490_s24, 2048 }
  0x2c   : > { %p1394_p2 = scmp.ne.s32.totalorder %s1387_s22, %s1393_s23  ;;  %p1399_p5 = scmp.lt.s32.totalorder %s1397_s26, %s1393_s23 }
  0x2e   : > { %p1395_p3 = pnand %p1394_p2, %p1562_p10 }
  0x30   : > { %p1396_p4 = pneg %p1395_p3 }
  0x32   : > { %p1401_p6 = pnand %p1399_p5, %p1396_p4 }
  0x34   : > { %1404 = shalt.err (!%p1401_p6)
}
  0x35   : > { %s1491_s28 = smov 128   ;;  %s1492_s29 = smov 8  }
  0x36   : > { %128 = dma.hbm_to_vmem [thread:$0]  (%p1562_p10), %s1573_s4, %s1296_s5, %s123_s3, %s1559_s25, %s1491_s28, %s1491_s28, %s1492_s29  }
  0x37 PF: > { %p1297_p8 = scmp.ge.s32.totalorder %s1488_s11, 1  ;;  %p130_p9 = scmp.lt.s32.totalorder %s1488_s11, 4 }
  0x39   : > { %p131_p11 = pnand %p1297_p8, %p130_p9 }
  0x3b   : > { %134 = sbr.rel (%p131_p11) target bundleno = 478 (0x1de), region = 24 }
  0x40   : > { %s136_s30 = sand.u32 1, %s1472_s7  }
  0x41   : > { %s1298_s2 = sshll.u32 %s136_s30, 10  ;;  %s137_s6 = scalar_lea.sflag [#allocation4], %s136_s30 }
  0x42   : > { %s1599_s14 = scalar_lea.vmem [#allocation3], %s1298_s2 }
  0x43   : > { %1459 = dma.done.wait (%p1546_p7), %s137_s6, 16384  }
  0x44   : > { %1461 = vsyncadd (%p1546_p7), %s137_s6, 4294950912  ;;  %p1299_p10 = scmp.ne.s32.totalorder %s1480_s9, 0 }
  0x46   : > { %165 = sbr.rel (%p1299_p10) target bundleno = 77 (0x4d), region = 32 }
  0x4b   : > { %v1493_v0 = vmov 0.0  }
  0x4c   : > { %166 = vst [vmem:[#allocation2] sm:$0x1] %v1493_v0 }
  0x4d PF: > { %v170_v1 = vlaneseq  ;;  %s1300_s21 = sshll.u32 %s1480_s9, 10  ;;  %p1301_p7 = scmp.ne.s32.totalorder %s1480_s9, 2 }
  0x4e   : > { %v1618_v6 = vstv %s1300_s21 }
  0x4f   : > { %v1607_v2 = vshrl.u32 %v170_v1, 7 }
  0x51   : > { %2595 = vst [vmem:[#allocation9_spill] sm:$0xff] %v1607_v2  ;;  %v1610_v3 = vadd.s32 264, %v1607_v2  ;;  %v1613_v4 = vadd.s32 272, %v1607_v2  ;;  %v1616_v5 = vadd.s32 280, %v1607_v2  ;;  %v1621_v7 = vadd.s32 288, %v1607_v2 }
  0x52   : > { %v1624_v8 = vadd.s32 296, %v1607_v2  ;;  %v1627_v9 = vadd.s32 304, %v1607_v2  ;;  %v1630_v10 = vadd.s32 312, %v1607_v2  ;;  %v1633_v11 = vadd.s32 320, %v1607_v2 }
  0x53   : > { %v1636_v12 = vadd.s32 328, %v1607_v2  ;;  %v1639_v13 = vadd.s32 336, %v1607_v2  ;;  %v1642_v14 = vadd.s32 344, %v1607_v2  ;;  %v1645_v15 = vadd.s32 352, %v1607_v2 }
  0x54   : > { %v1648_v16 = vadd.s32 360, %v1607_v2  ;;  %v1651_v17 = vadd.s32 368, %v1607_v2  ;;  %v1654_v18 = vadd.s32 376, %v1607_v2  ;;  %v1657_v19 = vadd.s32 384, %v1607_v2 }
  0x55   : > { %v1660_v20 = vadd.s32 392, %v1607_v2  ;;  %v1663_v21 = vadd.s32 400, %v1607_v2  ;;  %v1666_v22 = vadd.s32 408, %v1607_v2  ;;  %v1669_v23 = vadd.s32 416, %v1607_v2 }
  0x56   : > { %v1672_v24 = vadd.s32 424, %v1607_v2  ;;  %v1675_v25 = vadd.s32 432, %v1607_v2  ;;  %v1678_v26 = vadd.s32 440, %v1607_v2  ;;  %v1681_v27 = vadd.s32 448, %v1607_v2 }
  0x57   : > { %v1684_v28 = vadd.s32 456, %v1607_v2  ;;  %v1687_v29 = vadd.s32 464, %v1607_v2  ;;  %v1690_v30 = vadd.s32 472, %v1607_v2  ;;  %v1693_v31 = vadd.s32 480, %v1607_v2 }
  0x58   : > { %v1696_v32 = vadd.s32 488, %v1607_v2  ;;  %v1699_v33 = vadd.s32 496, %v1607_v2  ;;  %v1702_v34 = vadd.s32 504, %v1607_v2  ;;  %v1705_v35 = vadd.s32 512, %v1607_v2 }
  0x59   : > { %v1708_v36 = vadd.s32 520, %v1607_v2  ;;  %v1711_v37 = vadd.s32 528, %v1607_v2  ;;  %v1714_v38 = vadd.s32 536, %v1607_v2  ;;  %v1717_v39 = vadd.s32 544, %v1607_v2 }
  0x5a   : > { %v1720_v40 = vadd.s32 552, %v1607_v2  ;;  %v1723_v41 = vadd.s32 560, %v1607_v2  ;;  %v1726_v42 = vadd.s32 568, %v1607_v2  ;;  %v1729_v43 = vadd.s32 576, %v1607_v2 }
  0x5b   : > { %v1732_v44 = vadd.s32 584, %v1607_v2  ;;  %v1735_v45 = vadd.s32 592, %v1607_v2  ;;  %v1738_v46 = vadd.s32 600, %v1607_v2  ;;  %v1741_v47 = vadd.s32 608, %v1607_v2 }
  0x5c   : > { %v1744_v48 = vadd.s32 616, %v1607_v2  ;;  %v1747_v49 = vadd.s32 624, %v1607_v2  ;;  %v1750_v50 = vadd.s32 632, %v1607_v2  ;;  %v1753_v51 = vadd.s32 640, %v1607_v2 }
  0x5d   : > { %v1756_v52 = vadd.s32 648, %v1607_v2  ;;  %v1759_v53 = vadd.s32 656, %v1607_v2  ;;  %v1762_v54 = vadd.s32 664, %v1607_v2  ;;  %v1765_v55 = vadd.s32 672, %v1607_v2 }
  0x5e   : > { %v1768_v56 = vadd.s32 680, %v1607_v2  ;;  %v1771_v57 = vadd.s32 688, %v1607_v2  ;;  %v1774_v58 = vadd.s32 696, %v1607_v2  ;;  %v1777_v59 = vadd.s32 704, %v1607_v2 }
  0x5f   : > { %v1780_v60 = vadd.s32 712, %v1607_v2  ;;  %v1783_v61 = vadd.s32 720, %v1607_v2  ;;  %v1786_v62 = vadd.s32 728, %v1607_v2  ;;  %v1789_v63 = vadd.s32 736, %v1607_v2 }
  0x60   : > { %2596 = vst [vmem:[#allocation10_spill] sm:$0xff] %v1777_v59  ;;  %v1792_v0 = vadd.s32 744, %v1607_v2  ;;  %v1795_v1 = vadd.s32 752, %v1607_v2  ;;  %v1798_v59 = vadd.s32 760, %v1607_v2 }
  0x61   : > { %2597 = vst [vmem:[#allocation11_spill] sm:$0xff] %v1780_v60  ;;  %v1801_v60 = vadd.s32 768, %v1607_v2 }
  0x62   : > { %2598 = vst [vmem:[#allocation12_spill] sm:$0xff] %v1783_v61  ;;  %v1804_v61 = vadd.s32 776, %v1607_v2 }
  0x63   : > { %2599 = vst [vmem:[#allocation13_spill] sm:$0xff] %v1786_v62  ;;  %v1807_v62 = vadd.s32 784, %v1607_v2 }
  0x64   : > { %2600 = vst [vmem:[#allocation14_spill] sm:$0xff] %v1789_v63  ;;  %v1810_v63 = vadd.s32 792, %v1607_v2 }
  0x65   : > { %2601 = vst [vmem:[#allocation15_spill] sm:$0xff] %v1792_v0  ;;  %v1813_v0 = vadd.s32 800, %v1607_v2 }
  0x66   : > { %2602 = vst [vmem:[#allocation16_spill] sm:$0xff] %v1795_v1  ;;  %v1816_v1 = vadd.s32 808, %v1607_v2 }
  0x67   : > { %2603 = vst [vmem:[#allocation17_spill] sm:$0xff] %v1798_v59  ;;  %v1819_v59 = vadd.s32 816, %v1607_v2 }
  0x68   : > { %2604 = vst [vmem:[#allocation18_spill] sm:$0xff] %v1801_v60  ;;  %v1822_v60 = vadd.s32 824, %v1607_v2 }
  0x69   : > { %2605 = vst [vmem:[#allocation19_spill] sm:$0xff] %v1804_v61  ;;  %v1825_v61 = vadd.s32 832, %v1607_v2 }
  0x6a   : > { %2606 = vst [vmem:[#allocation20_spill] sm:$0xff] %v1807_v62  ;;  %v1828_v62 = vadd.s32 840, %v1607_v2 }
  0x6b   : > { %2607 = vst [vmem:[#allocation21_spill] sm:$0xff] %v1810_v63  ;;  %v1831_v63 = vadd.s32 848, %v1607_v2 }
  0x6c   : > { %2608 = vst [vmem:[#allocation22_spill] sm:$0xff] %v1813_v0  ;;  %v1834_v0 = vadd.s32 856, %v1607_v2 }
  0x6d   : > { %2609 = vst [vmem:[#allocation23_spill] sm:$0xff] %v1816_v1  ;;  %v1837_v1 = vadd.s32 864, %v1607_v2 }
  0x6e   : > { %2610 = vst [vmem:[#allocation24_spill] sm:$0xff] %v1819_v59  ;;  %v1840_v59 = vadd.s32 872, %v1607_v2 }
  0x6f   : > { %2611 = vst [vmem:[#allocation25_spill] sm:$0xff] %v1822_v60  ;;  %v1843_v60 = vadd.s32 880, %v1607_v2 }
  0x70   : > { %2612 = vst [vmem:[#allocation26_spill] sm:$0xff] %v1825_v61  ;;  %v1846_v61 = vadd.s32 888, %v1607_v2 }
  0x71   : > { %2613 = vst [vmem:[#allocation27_spill] sm:$0xff] %v1828_v62  ;;  %v1849_v62 = vadd.s32 896, %v1607_v2 }
  0x72   : > { %2614 = vst [vmem:[#allocation28_spill] sm:$0xff] %v1831_v63  ;;  %v1852_v63 = vadd.s32 904, %v1607_v2 }
  0x73   : > { %2615 = vst [vmem:[#allocation29_spill] sm:$0xff] %v1834_v0  ;;  %v1855_v0 = vadd.s32 912, %v1607_v2 }
  0x74   : > { %2616 = vst [vmem:[#allocation30_spill] sm:$0xff] %v1837_v1  ;;  %v1858_v1 = vadd.s32 920, %v1607_v2 }
  0x75   : > { %2617 = vst [vmem:[#allocation31_spill] sm:$0xff] %v1840_v59  ;;  %v1861_v59 = vadd.s32 928, %v1607_v2 }
  0x76   : > { %2618 = vst [vmem:[#allocation32_spill] sm:$0xff] %v1843_v60  ;;  %v1864_v60 = vadd.s32 936, %v1607_v2 }
  0x77   : > { %2619 = vst [vmem:[#allocation33_spill] sm:$0xff] %v1846_v61  ;;  %v1867_v61 = vadd.s32 944, %v1607_v2 }
  0x78   : > { %2620 = vst [vmem:[#allocation34_spill] sm:$0xff] %v1849_v62  ;;  %v1870_v62 = vadd.s32 952, %v1607_v2 }
  0x79   : > { %2621 = vst [vmem:[#allocation35_spill] sm:$0xff] %v1852_v63  ;;  %v1873_v63 = vadd.s32 960, %v1607_v2 }
  0x7a   : > { %2622 = vst [vmem:[#allocation36_spill] sm:$0xff] %v1855_v0  ;;  %v1876_v0 = vadd.s32 968, %v1607_v2 }
  0x7b   : > { %2623 = vst [vmem:[#allocation37_spill] sm:$0xff] %v1858_v1  ;;  %v1879_v1 = vadd.s32 976, %v1607_v2 }
  0x7c   : > { %2624 = vst [vmem:[#allocation38_spill] sm:$0xff] %v1861_v59  ;;  %v1882_v59 = vadd.s32 984, %v1607_v2 }
  0x7d   : > { %2625 = vst [vmem:[#allocation39_spill] sm:$0xff] %v1864_v60  ;;  %v1885_v60 = vadd.s32 992, %v1607_v2 }
  0x7e   : > { %2626 = vst [vmem:[#allocation40_spill] sm:$0xff] %v1867_v61  ;;  %v1888_v61 = vadd.s32 1000, %v1607_v2 }
  0x7f   : > { %2627 = vst [vmem:[#allocation41_spill] sm:$0xff] %v1870_v62  ;;  %v1891_v62 = vadd.s32 1008, %v1607_v2 }
  0x80   : > { %2628 = vst [vmem:[#allocation42_spill] sm:$0xff] %v1873_v63  ;;  %v1894_v63 = vadd.s32 1016, %v1607_v2  ;;  %v1914_v2 = vadd.s32 %v1618_v6, %v1624_v8  ;;  %v1934_v8 = vadd.s32 %v1618_v6, %v1639_v13  ;;  %v1954_v13 = vadd.s32 %v1618_v6, %v1654_v18 }
  0x81   : > { %2629 = vst [vmem:[#allocation43_spill] sm:$0xff] %v1876_v0  ;;  %v1898_v0 = vadd.s32 %v1618_v6, %v1610_v3  ;;  %v1918_v3 = vadd.s32 %v1618_v6, %v1627_v9  ;;  %v1938_v9 = vadd.s32 %v1618_v6, %v1642_v14  ;;  %v1958_v14 = vadd.s32 %v1618_v6, %v1657_v19 }
  0x82   : > { %2630 = vst [vmem:[#allocation44_spill] sm:$0xff] %v1879_v1  ;;  %v1902_v1 = vadd.s32 %v1618_v6, %v1613_v4  ;;  %v1922_v4 = vadd.s32 %v1618_v6, %v1630_v10  ;;  %v1942_v10 = vadd.s32 %v1618_v6, %v1645_v15  ;;  %v1962_v15 = vadd.s32 %v1618_v6, %v1660_v20 }
  0x83   : > { %2631 = vst [vmem:[#allocation45_spill] sm:$0xff] %v1885_v60  ;;  %v1906_v60 = vadd.s32 %v1618_v6, %v1616_v5  ;;  %v1926_v5 = vadd.s32 %v1618_v6, %v1633_v11  ;;  %v1946_v11 = vadd.s32 %v1618_v6, %v1648_v16  ;;  %v1966_v16 = vadd.s32 %v1618_v6, %v1663_v21 }
  0x84   : > { %2632 = vst [vmem:[#allocation46_spill] sm:$0xff] %v1888_v61  ;;  %v1910_v61 = vadd.s32 %v1618_v6, %v1621_v7  ;;  %v1930_v7 = vadd.s32 %v1618_v6, %v1636_v12  ;;  %v1950_v12 = vadd.s32 %v1618_v6, %v1651_v17  ;;  %v1970_v17 = vadd.s32 %v1618_v6, %v1666_v22 }
  0x85   : > { %v1974_v18 = vadd.s32 %v1618_v6, %v1669_v23  ;;  %v1978_v19 = vadd.s32 %v1618_v6, %v1672_v24  ;;  %v1982_v20 = vadd.s32 %v1618_v6, %v1675_v25  ;;  %v1986_v21 = vadd.s32 %v1618_v6, %v1678_v26 }
  0x86   : > { %v1990_v22 = vadd.s32 %v1618_v6, %v1681_v27  ;;  %v1994_v23 = vadd.s32 %v1618_v6, %v1684_v28  ;;  %v1998_v24 = vadd.s32 %v1618_v6, %v1687_v29  ;;  %v2002_v25 = vadd.s32 %v1618_v6, %v1690_v30 }
  0x87   : > { %v2006_v26 = vadd.s32 %v1618_v6, %v1693_v31  ;;  %v2010_v27 = vadd.s32 %v1618_v6, %v1696_v32  ;;  %v2014_v28 = vadd.s32 %v1618_v6, %v1699_v33  ;;  %v2018_v29 = vadd.s32 %v1618_v6, %v1702_v34 }
  0x88   : > { %v2022_v30 = vadd.s32 %v1618_v6, %v1705_v35  ;;  %v2026_v31 = vadd.s32 %v1618_v6, %v1708_v36  ;;  %v2030_v32 = vadd.s32 %v1618_v6, %v1711_v37  ;;  %v2034_v33 = vadd.s32 %v1618_v6, %v1714_v38 }
  0x89   : > { %v2038_v34 = vadd.s32 %v1618_v6, %v1717_v39  ;;  %v2042_v35 = vadd.s32 %v1618_v6, %v1720_v40  ;;  %v2046_v36 = vadd.s32 %v1618_v6, %v1723_v41  ;;  %v2050_v37 = vadd.s32 %v1618_v6, %v1726_v42 }
  0x8a   : > { %v2054_v38 = vadd.s32 %v1618_v6, %v1729_v43  ;;  %v2058_v39 = vadd.s32 %v1618_v6, %v1732_v44  ;;  %v2062_v40 = vadd.s32 %v1618_v6, %v1735_v45  ;;  %v2066_v41 = vadd.s32 %v1618_v6, %v1738_v46 }
  0x8b   : > { %v2070_v42 = vadd.s32 %v1618_v6, %v1741_v47  ;;  %v2074_v43 = vadd.s32 %v1618_v6, %v1744_v48  ;;  %v2078_v44 = vadd.s32 %v1618_v6, %v1747_v49  ;;  %v2082_v45 = vadd.s32 %v1618_v6, %v1750_v50 }
  0x8c   : > { %2633 = vst [vmem:[#allocation47_spill] sm:$0xff] %v2062_v40  ;;  %v2086_v46 = vadd.s32 %v1618_v6, %v1753_v51  ;;  %v2090_v47 = vadd.s32 %v1618_v6, %v1756_v52  ;;  %v2094_v48 = vadd.s32 %v1618_v6, %v1759_v53  ;;  %v2098_v49 = vadd.s32 %v1618_v6, %v1762_v54  ;;  %v434_v40 = vld [vmem:[%s1599_s14 + $0x30] sm:$0xff] }
  0x8d   : > { %2634 = vst [vmem:[#allocation48_spill] sm:$0xff] %v2066_v41  ;;  %v2102_v50 = vadd.s32 %v1618_v6, %v1765_v55  ;;  %v2106_v51 = vadd.s32 %v1618_v6, %v1768_v56  ;;  %v2110_v52 = vadd.s32 %v1618_v6, %v1771_v57  ;;  %v2114_v53 = vadd.s32 %v1618_v6, %v1774_v58 }
  0x8e   : > { %2635 = vst [vmem:[#allocation49_spill] sm:$0xff] %v2070_v42  ;;  %v433_v42 = vld [vmem:[%s1599_s14 + $0x28] sm:$0xff] }
  0x8f   : > { %2636 = vst [vmem:[#allocation50_spill] sm:$0xff] %v2074_v43  ;;  %v432_v43 = vld [vmem:[%s1599_s14 + $0x20] sm:$0xff] }
  0x90   : > { %2637 = vst [vmem:[#allocation51_spill] sm:$0xff] %v2078_v44  ;;  %v431_v44 = vld [vmem:[%s1599_s14 + $0x18] sm:$0xff] }
  0x91   : > { %2638 = vst [vmem:[#allocation52_spill] sm:$0xff] %v2082_v45 }
  0x92   : > { %2639 = vst [vmem:[#allocation53_spill] sm:$0xff] %v2086_v46 }
  0x93   : > { %2640 = vst [vmem:[#allocation54_spill] sm:$0xff] %v2090_v47  ;;  %v430_v47 = vld [vmem:[%s1599_s14 + $0x10] sm:$0xff] }
  0x94   : > { %2641 = vst [vmem:[#allocation55_spill] sm:$0xff] %v2094_v48  ;;  %v2647_v48 = vld [vmem:[#allocation10_spill] sm:$0xff] }
  0x95   : > { %2642 = vst [vmem:[#allocation56_spill] sm:$0xff] %v2098_v49  ;;  %v2118_v54 = vadd.s32 %v1618_v6, %v2647_v48  ;;  %v2649_v49 = vld [vmem:[#allocation11_spill] sm:$0xff] }
  0x96   : > { %2643 = vst [vmem:[#allocation57_spill] sm:$0xff] %v2102_v50  ;;  %v2122_v55 = vadd.s32 %v1618_v6, %v2649_v49  ;;  %v2651_v50 = vld [vmem:[#allocation12_spill] sm:$0xff] }
  0x97   : > { %2644 = vst [vmem:[#allocation58_spill] sm:$0xff] %v2106_v51  ;;  %v2126_v56 = vadd.s32 %v1618_v6, %v2651_v50  ;;  %v2653_v51 = vld [vmem:[#allocation13_spill] sm:$0xff] }
  0x98   : > { %2645 = vst [vmem:[#allocation59_spill] sm:$0xff] %v2110_v52  ;;  %v2130_v57 = vadd.s32 %v1618_v6, %v2653_v51  ;;  %v2655_v52 = vld [vmem:[#allocation14_spill] sm:$0xff] }
  0x99   : > { %2646 = vst [vmem:[#allocation60_spill] sm:$0xff] %v2114_v53  ;;  %v2134_v58 = vadd.s32 %v1618_v6, %v2655_v52  ;;  %v2657_v53 = vld [vmem:[#allocation15_spill] sm:$0xff] }
  0x9a   : > { %2648 = vst [vmem:[#allocation10_spill] sm:$0xff] %v2118_v54  ;;  %v2138_v48 = vadd.s32 %v1618_v6, %v2657_v53  ;;  %v2659_v54 = vld [vmem:[#allocation16_spill] sm:$0xff] }
  0x9b   : > { %2650 = vst [vmem:[#allocation11_spill] sm:$0xff] %v2122_v55  ;;  %v2142_v49 = vadd.s32 %v1618_v6, %v2659_v54  ;;  %v2661_v55 = vld [vmem:[#allocation17_spill] sm:$0xff] }
  0x9c   : > { %2652 = vst [vmem:[#allocation12_spill] sm:$0xff] %v2126_v56  ;;  %v2146_v50 = vadd.s32 %v1618_v6, %v2661_v55  ;;  %v2663_v56 = vld [vmem:[#allocation18_spill] sm:$0xff] }
  0x9d   : > { %2654 = vst [vmem:[#allocation13_spill] sm:$0xff] %v2130_v57  ;;  %v2150_v51 = vadd.s32 %v1618_v6, %v2663_v56  ;;  %v2665_v57 = vld [vmem:[#allocation19_spill] sm:$0xff] }
  0x9e   : > { %2656 = vst [vmem:[#allocation14_spill] sm:$0xff] %v2134_v58  ;;  %v2154_v52 = vadd.s32 %v1618_v6, %v2665_v57  ;;  %v2667_v58 = vld [vmem:[#allocation20_spill] sm:$0xff] }
  0x9f   : > { %2658 = vst [vmem:[#allocation15_spill] sm:$0xff] %v2138_v48  ;;  %v2158_v53 = vadd.s32 %v1618_v6, %v2667_v58  ;;  %v2669_v48 = vld [vmem:[#allocation21_spill] sm:$0xff] }
  0xa0   : > { %2660 = vst [vmem:[#allocation16_spill] sm:$0xff] %v2142_v49  ;;  %v2162_v54 = vadd.s32 %v1618_v6, %v2669_v48  ;;  %v2671_v49 = vld [vmem:[#allocation22_spill] sm:$0xff] }
  0xa1   : > { %2662 = vst [vmem:[#allocation17_spill] sm:$0xff] %v2146_v50  ;;  %v2166_v55 = vadd.s32 %v1618_v6, %v2671_v49  ;;  %v2673_v50 = vld [vmem:[#allocation23_spill] sm:$0xff] }
  0xa2   : > { %2664 = vst [vmem:[#allocation18_spill] sm:$0xff] %v2150_v51  ;;  %v2170_v56 = vadd.s32 %v1618_v6, %v2673_v50  ;;  %v2675_v51 = vld [vmem:[#allocation24_spill] sm:$0xff] }
  0xa3   : > { %2666 = vst [vmem:[#allocation19_spill] sm:$0xff] %v2154_v52  ;;  %v2174_v57 = vadd.s32 %v1618_v6, %v2675_v51  ;;  %v2677_v52 = vld [vmem:[#allocation25_spill] sm:$0xff] }
  0xa4   : > { %2668 = vst [vmem:[#allocation20_spill] sm:$0xff] %v2158_v53  ;;  %v2178_v58 = vadd.s32 %v1618_v6, %v2677_v52  ;;  %v2679_v53 = vld [vmem:[#allocation26_spill] sm:$0xff] }
  0xa5   : > { %2670 = vst [vmem:[#allocation21_spill] sm:$0xff] %v2162_v54  ;;  %v2182_v48 = vadd.s32 %v1618_v6, %v2679_v53  ;;  %v2681_v54 = vld [vmem:[#allocation27_spill] sm:$0xff] }
  0xa6   : > { %2672 = vst [vmem:[#allocation22_spill] sm:$0xff] %v2166_v55  ;;  %v2186_v49 = vadd.s32 %v1618_v6, %v2681_v54  ;;  %v2683_v55 = vld [vmem:[#allocation28_spill] sm:$0xff] }
  0xa7   : > { %2674 = vst [vmem:[#allocation23_spill] sm:$0xff] %v2170_v56  ;;  %v2190_v50 = vadd.s32 %v1618_v6, %v2683_v55  ;;  %v2685_v56 = vld [vmem:[#allocation29_spill] sm:$0xff] }
  0xa8   : > { %2676 = vst [vmem:[#allocation24_spill] sm:$0xff] %v2174_v57  ;;  %v2194_v51 = vadd.s32 %v1618_v6, %v2685_v56  ;;  %v2687_v57 = vld [vmem:[#allocation30_spill] sm:$0xff] }
  0xa9   : > { %2678 = vst [vmem:[#allocation25_spill] sm:$0xff] %v2178_v58  ;;  %v2198_v52 = vadd.s32 %v1618_v6, %v2687_v57  ;;  %v2689_v58 = vld [vmem:[#allocation31_spill] sm:$0xff] }
  0xaa   : > { %2680 = vst [vmem:[#allocation26_spill] sm:$0xff] %v2182_v48  ;;  %v2202_v53 = vadd.s32 %v1618_v6, %v2689_v58  ;;  %v2691_v48 = vld [vmem:[#allocation32_spill] sm:$0xff] }
  0xab   : > { %2682 = vst [vmem:[#allocation27_spill] sm:$0xff] %v2186_v49  ;;  %v2206_v54 = vadd.s32 %v1618_v6, %v2691_v48  ;;  %v2693_v49 = vld [vmem:[#allocation33_spill] sm:$0xff] }
  0xac   : > { %2684 = vst [vmem:[#allocation28_spill] sm:$0xff] %v2190_v50  ;;  %v2210_v55 = vadd.s32 %v1618_v6, %v2693_v49  ;;  %v2695_v50 = vld [vmem:[#allocation34_spill] sm:$0xff] }
  0xad   : > { %2686 = vst [vmem:[#allocation29_spill] sm:$0xff] %v2194_v51  ;;  %v2214_v56 = vadd.s32 %v1618_v6, %v2695_v50  ;;  %v2697_v51 = vld [vmem:[#allocation35_spill] sm:$0xff] }
  0xae   : > { %2688 = vst [vmem:[#allocation30_spill] sm:$0xff] %v2198_v52  ;;  %v2218_v57 = vadd.s32 %v1618_v6, %v2697_v51  ;;  %v2699_v52 = vld [vmem:[#allocation36_spill] sm:$0xff] }
  0xaf   : > { %2690 = vst [vmem:[#allocation31_spill] sm:$0xff] %v2202_v53  ;;  %v2222_v58 = vadd.s32 %v1618_v6, %v2699_v52  ;;  %v2701_v53 = vld [vmem:[#allocation37_spill] sm:$0xff] }
  0xb0   : > { %2692 = vst [vmem:[#allocation32_spill] sm:$0xff] %v2206_v54  ;;  %v2226_v48 = vadd.s32 %v1618_v6, %v2701_v53  ;;  %v2703_v54 = vld [vmem:[#allocation38_spill] sm:$0xff] }
  0xb1   : > { %2694 = vst [vmem:[#allocation33_spill] sm:$0xff] %v2210_v55  ;;  %v2230_v49 = vadd.s32 %v1618_v6, %v2703_v54  ;;  %v2705_v55 = vld [vmem:[#allocation39_spill] sm:$0xff] }
  0xb2   : > { %2696 = vst [vmem:[#allocation34_spill] sm:$0xff] %v2214_v56  ;;  %v2234_v50 = vadd.s32 %v1618_v6, %v2705_v55  ;;  %v2707_v56 = vld [vmem:[#allocation40_spill] sm:$0xff] }
  0xb3   : > { %2698 = vst [vmem:[#allocation35_spill] sm:$0xff] %v2218_v57  ;;  %v2238_v51 = vadd.s32 %v1618_v6, %v2707_v56  ;;  %v2709_v57 = vld [vmem:[#allocation41_spill] sm:$0xff]  ;;  %v2258_v56 = vadd.s32 %v1618_v6, %v1882_v59 }
  0xb4   : > { %2700 = vst [vmem:[#allocation36_spill] sm:$0xff] %v2222_v58  ;;  %v2242_v52 = vadd.s32 %v1618_v6, %v2709_v57  ;;  %v2711_v58 = vld [vmem:[#allocation42_spill] sm:$0xff]  ;;  %v2718_v57 = vld [vmem:[#allocation45_spill] sm:$0xff] }
  0xb5   : > { %2702 = vst [vmem:[#allocation37_spill] sm:$0xff] %v2226_v48  ;;  %v2246_v53 = vadd.s32 %v1618_v6, %v2711_v58  ;;  %v2713_v48 = vld [vmem:[#allocation43_spill] sm:$0xff]  ;;  %v2720_v58 = vld [vmem:[#allocation46_spill] sm:$0xff] }
  0xb6   : > { %2704 = vst [vmem:[#allocation38_spill] sm:$0xff] %v2230_v49  ;;  %v2250_v54 = vadd.s32 %v1618_v6, %v2713_v48  ;;  %v2715_v49 = vld [vmem:[#allocation44_spill] sm:$0xff]  ;;  %v2270_v48 = vadd.s32 %v1618_v6, %v1891_v62 }
  0xb7   : > { %2706 = vst [vmem:[#allocation39_spill] sm:$0xff] %v2234_v50  ;;  %v2254_v55 = vadd.s32 %v1618_v6, %v2715_v49  ;;  %v2274_v49 = vadd.s32 %v1618_v6, %v1894_v63 }
  0xb8   : > { %2708 = vst [vmem:[#allocation40_spill] sm:$0xff] %v2238_v51 }
  0xb9   : > { %2710 = vst [vmem:[#allocation41_spill] sm:$0xff] %v2242_v52  ;;  %v2262_v52 = vadd.s32 %v1618_v6, %v2718_v57 }
  0xba   : > { %2712 = vst [vmem:[#allocation42_spill] sm:$0xff] %v2246_v53  ;;  %v2266_v53 = vadd.s32 %v1618_v6, %v2720_v58 }
  0xbb   : > { %2714 = vst [vmem:[#allocation43_spill] sm:$0xff] %v2250_v54  ;;  %v429_v54 = vld [vmem:[%s1599_s14 + $0x8] sm:$0xff] }
  0xbc   : > { %2716 = vst [vmem:[#allocation44_spill] sm:$0xff] %v2254_v55  ;;  %v2724_v55 = vld [vmem:[#allocation9_spill] sm:$0xff] }
  0xbd   : > { %2717 = vst [vmem:[#allocation61_spill] sm:$0xff] %v2258_v56  ;;  %v172_v59 = vadd.s32 8, %v2724_v55  ;;  %v173_v56 = vadd.s32 16, %v2724_v55  ;;  %v174_v57 = vadd.s32 24, %v2724_v55  ;;  %v176_v63 = vadd.s32 40, %v2724_v55 }
  0xbe   : > { %2719 = vst [vmem:[#allocation45_spill] sm:$0xff] %v2262_v52  ;;  %v300_v52 = vadd.s32 %v1618_v6, %v2724_v55  ;;  %v177_v51 = vadd.s32 48, %v2724_v55 }
  0xbf   : > { %2721 = vst [vmem:[#allocation46_spill] sm:$0xff] %v2266_v53  ;;  %v301_v58 = vadd.s32 %v1618_v6, %v172_v59  ;;  %v175_v53 = vadd.s32 32, %v2724_v55  ;;  %v302_v62 = vadd.s32 %v1618_v6, %v173_v56  ;;  %v178_v56 = vadd.s32 56, %v2724_v55 }
  0xc0   : > { %2722 = vst [vmem:[#allocation62_spill] sm:$0xff] %v2270_v48  ;;  %v428_v48 = vld [vmem:[%s1599_s14] sm:$0xff]  ;;  %vm556_vm0 = vcmp.lt.s32.totalorder %v300_v52, 3000  ;;  %v305_v45 = vadd.s32 %v1618_v6, %v176_v63  ;;  %v179_v52 = vadd.s32 64, %v2724_v55 }
  0xc1   : > { %2723 = vst [vmem:[#allocation63_spill] sm:$0xff] %v2274_v49  ;;  %v303_v49 = vadd.s32 %v1618_v6, %v174_v57  ;;  %vm557_vm1 = vcmp.lt.s32.totalorder %v301_v58, 3000  ;;  %v304_v50 = vadd.s32 %v1618_v6, %v175_v53  ;;  %vm558_vm2 = vcmp.lt.s32.totalorder %v302_v62, 3000 }
  0xc2   : > { %v940_v59 = vsel %vm556_vm0, %v428_v48, 0.0  ;;  %v941_v46 = vsel %vm557_vm1, %v429_v54, 0.0  ;;  %v942_v57 = vsel %vm558_vm2, %v430_v47, 0.0  ;;  %v306_v58 = vadd.s32 %v1618_v6, %v177_v51 }
  0xc3   : > { %vm559_vm3 = vcmp.lt.s32.totalorder %v303_v49, 3000  ;;  %vm560_vm4 = vcmp.lt.s32.totalorder %v304_v50, 3000  ;;  %v1069_v53 = vadd.f32 %v941_v46, %v940_v59  ;;  %v180_v48 = vadd.s32 72, %v2724_v55  ;;  %v435_v59 = vld [vmem:[%s1599_s14 + $0x38] sm:$0xff] }
  0xc4   : > { %v943_v62 = vsel %vm559_vm3, %v431_v44, 0.0  ;;  %v307_v54 = vadd.s32 %v1618_v6, %v178_v56  ;;  %vm561_vm5 = vcmp.lt.s32.totalorder %v305_v45, 3000  ;;  %v944_v49 = vsel %vm560_vm4, %v432_v43, 0.0 }
  0xc5   : > { %v1070_v63 = vadd.f32 %v1069_v53, %v942_v57  ;;  %v181_v47 = vadd.s32 80, %v2724_v55  ;;  %v308_v41 = vadd.s32 %v1618_v6, %v179_v52  ;;  %vm562_vm6 = vcmp.lt.s32.totalorder %v306_v58, 3000  ;;  %v436_v53 = vld [vmem:[%s1599_s14 + $0x40] sm:$0xff] }
  0xc6   : > { %v945_v46 = vsel %vm561_vm5, %v433_v42, 0.0  ;;  %v182_v44 = vadd.s32 88, %v2724_v55  ;;  %v309_v50 = vadd.s32 %v1618_v6, %v180_v48  ;;  %vm563_vm7 = vcmp.lt.s32.totalorder %v307_v54, 3000 }
  0xc7   : > { %v1071_v51 = vadd.f32 %v1070_v63, %v943_v62  ;;  %v946_v45 = vsel %vm562_vm6, %v434_v40, 0.0  ;;  %v183_v43 = vadd.s32 96, %v2724_v55  ;;  %v310_v57 = vadd.s32 %v1618_v6, %v181_v47  ;;  %v437_v63 = vld [vmem:[%s1599_s14 + $0x48] sm:$0xff] }
  0xc8   : > { %vm564_vm8 = vcmp.lt.s32.totalorder %v308_v41, 3000  ;;  %v947_v58 = vsel %vm563_vm7, %v435_v59, 0.0  ;;  %v184_v42 = vadd.s32 104, %v2724_v55  ;;  %v311_v62 = vadd.s32 %v1618_v6, %v182_v44 }
  0xc9   : > { %v1072_v56 = vadd.f32 %v1071_v51, %v944_v49  ;;  %vm565_vm9 = vcmp.lt.s32.totalorder %v309_v50, 3000  ;;  %v948_v54 = vsel %vm564_vm8, %v436_v53, 0.0  ;;  %v185_v40 = vadd.s32 112, %v2724_v55  ;;  %v438_v51 = vld [vmem:[%s1599_s14 + $0x50] sm:$0xff] }
  0xca   : > { %v312_v49 = vadd.s32 %v1618_v6, %v183_v43  ;;  %vm566_vm10 = vcmp.lt.s32.totalorder %v310_v57, 3000  ;;  %v949_v41 = vsel %vm565_vm9, %v437_v63, 0.0  ;;  %v313_v59 = vadd.s32 %v1618_v6, %v184_v42 }
  0xcb   : > { %v1073_v52 = vadd.f32 %v1072_v56, %v945_v46  ;;  %v186_v46 = vadd.s32 120, %v2724_v55  ;;  %v439_v56 = vld [vmem:[%s1599_s14 + $0x58] sm:$0xff]  ;;  %vm567_vm11 = vcmp.lt.s32.totalorder %v311_v62, 3000  ;;  %v950_v50 = vsel %vm566_vm10, %v438_v51, 0.0 }
  0xcc   : > { %v314_v53 = vadd.s32 %v1618_v6, %v185_v40  ;;  %vm568_vm12 = vcmp.lt.s32.totalorder %v312_v49, 3000  ;;  %v951_v57 = vsel %vm567_vm11, %v439_v56, 0.0  ;;  %vm569_vm13 = vcmp.lt.s32.totalorder %v313_v59, 3000 }
  0xcd   : > { %v1074_v48 = vadd.f32 %v1073_v52, %v946_v45  ;;  %v187_v45 = vadd.s32 128, %v2724_v55  ;;  %v440_v52 = vld [vmem:[%s1599_s14 + $0x60] sm:$0xff]  ;;  %v315_v63 = vadd.s32 %v1618_v6, %v186_v46 }
  0xce   : > { %v952_v62 = vsel %vm568_vm12, %v440_v52, 0.0  ;;  %vm570_vm14 = vcmp.lt.s32.totalorder %v314_v53, 3000 }
  0xcf   : > { %v1075_v47 = vadd.f32 %v1074_v48, %v947_v58  ;;  %v188_v58 = vadd.s32 136, %v2724_v55  ;;  %v441_v48 = vld [vmem:[%s1599_s14 + $0x68] sm:$0xff]  ;;  %v316_v51 = vadd.s32 %v1618_v6, %v187_v45  ;;  %vm571_vm15 = vcmp.lt.s32.totalorder %v315_v63, 3000 }
  0xd0   : > { %v953_v49 = vsel %vm569_vm13, %v441_v48, 0.0 }
  0xd1   : > { %v1076_v44 = vadd.f32 %v1075_v47, %v948_v54  ;;  %v189_v54 = vadd.s32 144, %v2724_v55  ;;  %v442_v47 = vld [vmem:[%s1599_s14 + $0x70] sm:$0xff]  ;;  %v317_v56 = vadd.s32 %v1618_v6, %v188_v58  ;;  %vm572_vm0 = vcmp.lt.s32.totalorder %v316_v51, 3000 }
  0xd2   : > { %v954_v59 = vsel %vm570_vm14, %v442_v47, 0.0 }
  0xd3   : > { %v1077_v43 = vadd.f32 %v1076_v44, %v949_v41  ;;  %v190_v41 = vadd.s32 152, %v2724_v55  ;;  %v443_v44 = vld [vmem:[%s1599_s14 + $0x78] sm:$0xff]  ;;  %v318_v52 = vadd.s32 %v1618_v6, %v189_v54  ;;  %vm573_vm1 = vcmp.lt.s32.totalorder %v317_v56, 3000 }
  0xd4   : > { %v955_v53 = vsel %vm571_vm15, %v443_v44, 0.0 }
  0xd5   : > { %v1078_v42 = vadd.f32 %v1077_v43, %v950_v50  ;;  %v191_v50 = vadd.s32 160, %v2724_v55  ;;  %v444_v43 = vld [vmem:[%s1599_s14 + $0x80] sm:$0xff]  ;;  %v319_v48 = vadd.s32 %v1618_v6, %v190_v41  ;;  %vm574_vm2 = vcmp.lt.s32.totalorder %v318_v52, 3000 }
  0xd6   : > { %v956_v63 = vsel %vm572_vm0, %v444_v43, 0.0 }
  0xd7   : > { %v1079_v40 = vadd.f32 %v1078_v42, %v951_v57  ;;  %v192_v57 = vadd.s32 168, %v2724_v55  ;;  %v445_v42 = vld [vmem:[%s1599_s14 + $0x88] sm:$0xff]  ;;  %v320_v47 = vadd.s32 %v1618_v6, %v191_v50  ;;  %vm575_vm3 = vcmp.lt.s32.totalorder %v319_v48, 3000 }
  0xd8   : > { %v957_v51 = vsel %vm573_vm1, %v445_v42, 0.0  ;;  %vm589_vm1 = vcmp.lt.s32.totalorder %v1898_v0, 3000 }
  0xd9   : > { %v1080_v46 = vadd.f32 %v1079_v40, %v952_v62  ;;  %v193_v62 = vadd.s32 176, %v2724_v55  ;;  %v446_v40 = vld [vmem:[%s1599_s14 + $0x90] sm:$0xff]  ;;  %v321_v44 = vadd.s32 %v1618_v6, %v192_v57  ;;  %vm576_vm4 = vcmp.lt.s32.totalorder %v320_v47, 3000 }
  0xda   : > { %v958_v56 = vsel %vm574_vm2, %v446_v40, 0.0  ;;  %vm590_vm2 = vcmp.lt.s32.totalorder %v1902_v1, 3000 }
  0xdb   : > { %v1081_v45 = vadd.f32 %v1080_v46, %v953_v49  ;;  %v194_v49 = vadd.s32 184, %v2724_v55  ;;  %v447_v46 = vld [vmem:[%s1599_s14 + $0x98] sm:$0xff]  ;;  %v322_v43 = vadd.s32 %v1618_v6, %v193_v62  ;;  %vm577_vm5 = vcmp.lt.s32.totalorder %v321_v44, 3000 }
  0xdc   : > { %v959_v52 = vsel %vm575_vm3, %v447_v46, 0.0  ;;  %vm591_vm3 = vcmp.lt.s32.totalorder %v1906_v60, 3000 }
  0xdd   : > { %v1082_v58 = vadd.f32 %v1081_v45, %v954_v59  ;;  %v195_v59 = vadd.s32 192, %v2724_v55  ;;  %v448_v45 = vld [vmem:[%s1599_s14 + $0xa0] sm:$0xff]  ;;  %v323_v42 = vadd.s32 %v1618_v6, %v194_v49  ;;  %vm578_vm6 = vcmp.lt.s32.totalorder %v322_v43, 3000 }
  0xde   : > { %v960_v48 = vsel %vm576_vm4, %v448_v45, 0.0  ;;  %vm592_vm4 = vcmp.lt.s32.totalorder %v1910_v61, 3000 }
  0xdf   : > { %v1083_v54 = vadd.f32 %v1082_v58, %v955_v53  ;;  %v196_v53 = vadd.s32 200, %v2724_v55  ;;  %v449_v58 = vld [vmem:[%s1599_s14 + $0xa8] sm:$0xff]  ;;  %v324_v40 = vadd.s32 %v1618_v6, %v195_v59  ;;  %vm579_vm7 = vcmp.lt.s32.totalorder %v323_v42, 3000 }
  0xe0   : > { %v961_v47 = vsel %vm577_vm5, %v449_v58, 0.0  ;;  %vm593_vm5 = vcmp.lt.s32.totalorder %v1914_v2, 3000 }
  0xe1   : > { %v1084_v41 = vadd.f32 %v1083_v54, %v956_v63  ;;  %v197_v63 = vadd.s32 208, %v2724_v55  ;;  %v450_v54 = vld [vmem:[%s1599_s14 + $0xb0] sm:$0xff]  ;;  %v325_v46 = vadd.s32 %v1618_v6, %v196_v53  ;;  %vm580_vm8 = vcmp.lt.s32.totalorder %v324_v40, 3000 }
  0xe2   : > { %v962_v44 = vsel %vm578_vm6, %v450_v54, 0.0  ;;  %vm594_vm6 = vcmp.lt.s32.totalorder %v1918_v3, 3000 }
  0xe3   : > { %v1085_v50 = vadd.f32 %v1084_v41, %v957_v51  ;;  %v198_v51 = vadd.s32 216, %v2724_v55  ;;  %v451_v41 = vld [vmem:[%s1599_s14 + $0xb8] sm:$0xff]  ;;  %v326_v45 = vadd.s32 %v1618_v6, %v197_v63  ;;  %vm581_vm9 = vcmp.lt.s32.totalorder %v325_v46, 3000 }
  0xe4   : > { %v963_v43 = vsel %vm579_vm7, %v451_v41, 0.0  ;;  %vm595_vm7 = vcmp.lt.s32.totalorder %v1922_v4, 3000 }
  0xe5   : > { %v1086_v57 = vadd.f32 %v1085_v50, %v958_v56  ;;  %v199_v56 = vadd.s32 224, %v2724_v55  ;;  %v452_v50 = vld [vmem:[%s1599_s14 + $0xc0] sm:$0xff]  ;;  %v327_v58 = vadd.s32 %v1618_v6, %v198_v51  ;;  %vm582_vm10 = vcmp.lt.s32.totalorder %v326_v45, 3000 }
  0xe6   : > { %v964_v42 = vsel %vm580_vm8, %v452_v50, 0.0  ;;  %vm596_vm8 = vcmp.lt.s32.totalorder %v1926_v5, 3000 }
  0xe7   : > { %v1087_v62 = vadd.f32 %v1086_v57, %v959_v52  ;;  %v200_v52 = vadd.s32 232, %v2724_v55  ;;  %v453_v57 = vld [vmem:[%s1599_s14 + $0xc8] sm:$0xff]  ;;  %v328_v54 = vadd.s32 %v1618_v6, %v199_v56  ;;  %vm583_vm11 = vcmp.lt.s32.totalorder %v327_v58, 3000  ;;  %v456_v56 = vld [vmem:[%s1599_s14 + $0xe0] sm:$0xff] }
  0xe8   : > { %v965_v40 = vsel %vm581_vm9, %v453_v57, 0.0  ;;  %v457_v57 = vld [vmem:[%s1599_s14 + $0xe8] sm:$0xff]  ;;  %vm597_vm9 = vcmp.lt.s32.totalorder %v1930_v7, 3000 }
  0xe9   : > { %v1088_v49 = vadd.f32 %v1087_v62, %v960_v48  ;;  %v201_v48 = vadd.s32 240, %v2724_v55  ;;  %v454_v62 = vld [vmem:[%s1599_s14 + $0xd0] sm:$0xff]  ;;  %v329_v41 = vadd.s32 %v1618_v6, %v200_v52  ;;  %vm584_vm12 = vcmp.lt.s32.totalorder %v328_v54, 3000 }
  0xea   : > { %v966_v46 = vsel %vm582_vm10, %v454_v62, 0.0  ;;  %vm598_vm10 = vcmp.lt.s32.totalorder %v1934_v8, 3000 }
  0xeb   : > { %v1089_v59 = vadd.f32 %v1088_v49, %v961_v47  ;;  %v202_v47 = vadd.s32 248, %v2724_v55  ;;  %v455_v49 = vld [vmem:[%s1599_s14 + $0xd8] sm:$0xff]  ;;  %v330_v50 = vadd.s32 %v1618_v6, %v201_v48  ;;  %vm585_vm13 = vcmp.lt.s32.totalorder %v329_v41, 3000 }
  0xec   : > { %v969_v62 = vsel %vm585_vm13, %v457_v57, 0.0  ;;  %v459_v48 = vld [vmem:[%s1599_s14 + $0xf8] sm:$0xff]  ;;  %vm601_vm13 = vcmp.lt.s32.totalorder %v1946_v11, 3000 }
  0xed   : > { %v1090_v53 = vadd.f32 %v1089_v59, %v962_v44  ;;  %v203_v44 = vadd.s32 256, %v2724_v55  ;;  %v967_v59 = vsel %vm583_vm11, %v455_v49, 0.0  ;;  %vm586_vm14 = vcmp.lt.s32.totalorder %v330_v50, 3000  ;;  %v461_v49 = vld [vmem:[%s1599_s14 + $0x108] sm:$0xff] }
  0xee   : > { %v973_v50 = vsel %vm589_vm1, %v461_v49, 0.0  ;;  %v471_v49 = vld [vmem:[%s1599_s14 + $0x158] sm:$0xff]  ;;  %vm599_vm11 = vcmp.lt.s32.totalorder %v1938_v9, 3000  ;;  %vm605_vm1 = vcmp.lt.s32.totalorder %v1962_v15, 3000 }
  0xef   : > { %v1091_v63 = vadd.f32 %v1090_v53, %v963_v43  ;;  %v331_v43 = vadd.s32 %v1618_v6, %v202_v47  ;;  %v968_v53 = vsel %vm584_vm12, %v456_v56, 0.0  ;;  %v332_v58 = vadd.s32 %v1618_v6, %v203_v44  ;;  %v463_v56 = vld [vmem:[%s1599_s14 + $0x118] sm:$0xff] }
  0xf0   : > { %v975_v0 = vsel %vm591_vm3, %v463_v56, 0.0  ;;  %vm600_vm12 = vcmp.lt.s32.totalorder %v1942_v10, 3000  ;;  %v983_v7 = vsel %vm599_vm11, %v471_v49, 0.0  ;;  %v474_v56 = vld [vmem:[%s1599_s14 + $0x170] sm:$0xff]  ;;  %vm607_vm3 = vcmp.lt.s32.totalorder %v1970_v17, 3000 }
  0xf1   : > { %v1092_v51 = vadd.f32 %v1091_v63, %v964_v42  ;;  %v458_v42 = vld [vmem:[%s1599_s14 + $0xf0] sm:$0xff]  ;;  %vm587_vm15 = vcmp.lt.s32.totalorder %v331_v43, 3000  ;;  %vm588_vm0 = vcmp.lt.s32.totalorder %v332_v58, 3000  ;;  %v464_v43 = vld [vmem:[%s1599_s14 + $0x120] sm:$0xff]  ;;  %vm615_vm11 = vcmp.lt.s32.totalorder %v2002_v25, 3000 }
  0xf2   : > { %v970_v63 = vsel %vm586_vm14, %v458_v42, 0.0  ;;  %v971_v41 = vsel %vm587_vm15, %v459_v48, 0.0  ;;  %v976_v1 = vsel %vm592_vm4, %v464_v43, 0.0  ;;  %v466_v58 = vld [vmem:[%s1599_s14 + $0x130] sm:$0xff]  ;;  %v468_v48 = vld [vmem:[%s1599_s14 + $0x140] sm:$0xff]  ;;  %vm602_vm14 = vcmp.lt.s32.totalorder %v1950_v12, 3000 }
  0xf3   : > { %v1093_v45 = vadd.f32 %v1092_v51, %v965_v40  ;;  %v460_v40 = vld [vmem:[%s1599_s14 + $0x100] sm:$0xff]  ;;  %v978_v61 = vsel %vm594_vm6, %v466_v58, 0.0  ;;  %v980_v3 = vsel %vm596_vm8, %v468_v48, 0.0  ;;  %vm603_vm15 = vcmp.lt.s32.totalorder %v1954_v13, 3000  ;;  %v486_v49 = vld [vmem:[%s1599_s14 + $0x1d0] sm:$0xff] }
  0xf4   : > { %v972_v51 = vsel %vm588_vm0, %v460_v40, 0.0  ;;  %v986_v10 = vsel %vm602_vm14, %v474_v56, 0.0  ;;  %vm604_vm0 = vcmp.lt.s32.totalorder %v1958_v14, 3000  ;;  %vm608_vm4 = vcmp.lt.s32.totalorder %v1974_v18, 3000 }
  0xf5   : > { %v1094_v52 = vadd.f32 %v1093_v45, %v966_v46  ;;  %v462_v46 = vld [vmem:[%s1599_s14 + $0x110] sm:$0xff]  ;;  %vm610_vm6 = vcmp.lt.s32.totalorder %v1982_v20, 3000  ;;  %vm612_vm8 = vcmp.lt.s32.totalorder %v1990_v22, 3000  ;;  %vm618_vm14 = vcmp.lt.s32.totalorder %v2014_v28, 3000 }
  0xf7   : > { %v1095_v55 = vadd.f32 %v1094_v52, %v967_v59  ;;  %v974_v59 = vsel %vm590_vm2, %v462_v46, 0.0  ;;  %v465_v52 = vld [vmem:[%s1599_s14 + $0x128] sm:$0xff]  ;;  %vm606_vm2 = vcmp.lt.s32.totalorder %v1966_v16, 3000 }
  0xf8   : > { %v977_v60 = vsel %vm593_vm5, %v465_v52, 0.0  ;;  %v477_v52 = vld [vmem:[%s1599_s14 + $0x188] sm:$0xff]  ;;  %vm609_vm5 = vcmp.lt.s32.totalorder %v1978_v19, 3000 }
  0xf9   : > { %v1096_v54 = vadd.f32 %v1095_v55, %v968_v53  ;;  %v467_v55 = vld [vmem:[%s1599_s14 + $0x138] sm:$0xff]  ;;  %v989_v13 = vsel %vm605_vm1, %v477_v52, 0.0  ;;  %vm621_vm1 = vcmp.lt.s32.totalorder %v2026_v31, 3000 }
  0xfa   : > { %v979_v2 = vsel %vm595_vm7, %v467_v55, 0.0  ;;  %v480_v55 = vld [vmem:[%s1599_s14 + $0x1a0] sm:$0xff]  ;;  %vm611_vm7 = vcmp.lt.s32.totalorder %v1986_v21, 3000  ;;  %v495_v52 = vld [vmem:[%s1599_s14 + $0x218] sm:$0xff] }
  0xfb   : > { %v1097_v47 = vadd.f32 %v1096_v54, %v969_v62  ;;  %v992_v16 = vsel %vm608_vm4, %v480_v55, 0.0  ;;  %vm624_vm4 = vcmp.lt.s32.totalorder %v2038_v34, 3000 }
  0xfd   : > { %v1098_v6 = vadd.f32 %v1097_v47, %v970_v63  ;;  %v469_v63 = vld [vmem:[%s1599_s14 + $0x148] sm:$0xff]  ;;  %v470_v47 = vld [vmem:[%s1599_s14 + $0x150] sm:$0xff] }
  0xfe   : > { %v981_v4 = vsel %vm597_vm9, %v469_v63, 0.0  ;;  %v982_v5 = vsel %vm598_vm10, %v470_v47, 0.0  ;;  %v483_v63 = vld [vmem:[%s1599_s14 + $0x1b8] sm:$0xff]  ;;  %vm613_vm9 = vcmp.lt.s32.totalorder %v1994_v23, 3000  ;;  %vm614_vm10 = vcmp.lt.s32.totalorder %v1998_v24, 3000 }
  0xff   : > { %v1099_v44 = vadd.f32 %v1098_v6, %v971_v41  ;;  %v995_v19 = vsel %vm611_vm7, %v483_v63, 0.0  ;;  %v998_v22 = vsel %vm614_vm10, %v486_v49, 0.0  ;;  %vm627_vm7 = vcmp.lt.s32.totalorder %v2050_v37, 3000  ;;  %v2726_v63 = vld [vmem:[#allocation48_spill] sm:$0xff]  ;;  %v506_v49 = vld [vmem:[%s1599_s14 + $0x270] sm:$0xff] }
 0x101   : > { %v1100_v45 = vadd.f32 %v1099_v44, %v972_v51  ;;  %v472_v51 = vld [vmem:[%s1599_s14 + $0x160] sm:$0xff]  ;;  %v473_v44 = vld [vmem:[%s1599_s14 + $0x168] sm:$0xff] }
 0x102   : > { %v984_v8 = vsel %vm600_vm12, %v472_v51, 0.0  ;;  %v985_v9 = vsel %vm601_vm13, %v473_v44, 0.0  ;;  %vm616_vm12 = vcmp.lt.s32.totalorder %v2006_v26, 3000  ;;  %v489_v44 = vld [vmem:[%s1599_s14 + $0x1e8] sm:$0xff]  ;;  %vm617_vm13 = vcmp.lt.s32.totalorder %v2010_v27, 3000 }
 0x103   : > { %v1101_v57 = vadd.f32 %v1100_v45, %v973_v50  ;;  %v1001_v25 = vsel %vm617_vm13, %v489_v44, 0.0  ;;  %v2731_v44 = vld [vmem:[#allocation53_spill] sm:$0xff] }
 0x105   : > { %v1102_v53 = vadd.f32 %v1101_v57, %v974_v59  ;;  %v475_v59 = vld [vmem:[%s1599_s14 + $0x178] sm:$0xff]  ;;  %v476_v57 = vld [vmem:[%s1599_s14 + $0x180] sm:$0xff] }
 0x106   : > { %v987_v11 = vsel %vm603_vm15, %v475_v59, 0.0  ;;  %v988_v12 = vsel %vm604_vm0, %v476_v57, 0.0  ;;  %vm619_vm15 = vcmp.lt.s32.totalorder %v2018_v29, 3000  ;;  %v492_v59 = vld [vmem:[%s1599_s14 + $0x200] sm:$0xff]  ;;  %vm620_vm0 = vcmp.lt.s32.totalorder %v2022_v30, 3000 }
 0x107   : > { %v1103_v42 = vadd.f32 %v1102_v53, %v975_v0  ;;  %v1004_v28 = vsel %vm620_vm0, %v492_v59, 0.0  ;;  %vm636_vm0 = vcmp.lt.s32.totalorder %v2731_v44, 3000  ;;  %v2747_v44 = vld [vmem:[#allocation18_spill] sm:$0xff] }
 0x109   : > { %v1104_v62 = vadd.f32 %v1103_v42, %v976_v1  ;;  %v478_v1 = vld [vmem:[%s1599_s14 + $0x190] sm:$0xff]  ;;  %v479_v42 = vld [vmem:[%s1599_s14 + $0x198] sm:$0xff] }
 0x10a   : > { %v990_v14 = vsel %vm606_vm2, %v478_v1, 0.0  ;;  %v991_v15 = vsel %vm607_vm3, %v479_v42, 0.0  ;;  %vm622_vm2 = vcmp.lt.s32.totalorder %v2030_v32, 3000  ;;  %vm623_vm3 = vcmp.lt.s32.totalorder %v2034_v33, 3000  ;;  %v498_v42 = vld [vmem:[%s1599_s14 + $0x230] sm:$0xff] }
 0x10b   : > { %v1105_v54 = vadd.f32 %v1104_v62, %v977_v60  ;;  %v1007_v31 = vsel %vm623_vm3, %v495_v52, 0.0 }
 0x10d   : > { %v1106_v40 = vadd.f32 %v1105_v54, %v978_v61  ;;  %v481_v61 = vld [vmem:[%s1599_s14 + $0x1a8] sm:$0xff]  ;;  %v482_v54 = vld [vmem:[%s1599_s14 + $0x1b0] sm:$0xff] }
 0x10e   : > { %v993_v17 = vsel %vm609_vm5, %v481_v61, 0.0  ;;  %v994_v18 = vsel %vm610_vm6, %v482_v54, 0.0  ;;  %vm625_vm5 = vcmp.lt.s32.totalorder %v2042_v35, 3000  ;;  %vm626_vm6 = vcmp.lt.s32.totalorder %v2046_v36, 3000  ;;  %v501_v61 = vld [vmem:[%s1599_s14 + $0x248] sm:$0xff]  ;;  %v2725_v54 = vld [vmem:[#allocation47_spill] sm:$0xff] }
 0x10f   : > { %v1107_v41 = vadd.f32 %v1106_v40, %v979_v2  ;;  %v1010_v34 = vsel %vm626_vm6, %v498_v42, 0.0  ;;  %vm630_vm10 = vcmp.lt.s32.totalorder %v2725_v54, 3000  ;;  %v515_v42 = vld [vmem:[%s1599_s14 + $0x2b8] sm:$0xff]  ;;  %v2741_v54 = vld [vmem:[#allocation12_spill] sm:$0xff] }
 0x111   : > { %v1108_v6 = vadd.f32 %v1107_v41, %v980_v3  ;;  %v484_v3 = vld [vmem:[%s1599_s14 + $0x1c0] sm:$0xff]  ;;  %v485_v41 = vld [vmem:[%s1599_s14 + $0x1c8] sm:$0xff] }
 0x112   : > { %v996_v20 = vsel %vm612_vm8, %v484_v3, 0.0  ;;  %v997_v21 = vsel %vm613_vm9, %v485_v41, 0.0  ;;  %vm628_vm8 = vcmp.lt.s32.totalorder %v2054_v38, 3000  ;;  %vm629_vm9 = vcmp.lt.s32.totalorder %v2058_v39, 3000  ;;  %v2727_v3 = vld [vmem:[#allocation49_spill] sm:$0xff]  ;;  %v2728_v41 = vld [vmem:[#allocation50_spill] sm:$0xff] }
 0x113   : > { %v1109_v46 = vadd.f32 %v1108_v6, %v981_v4  ;;  %v1013_v37 = vsel %vm629_vm9, %v501_v61, 0.0  ;;  %vm633_vm13 = vcmp.lt.s32.totalorder %v2728_v41, 3000  ;;  %v2740_v61 = vld [vmem:[#allocation11_spill] sm:$0xff] }
 0x114   : > { %vm645_vm9 = vcmp.lt.s32.totalorder %v2740_v61, 3000  ;;  %v2744_v41 = vld [vmem:[#allocation15_spill] sm:$0xff] }
 0x115   : > { %v1110_v50 = vadd.f32 %v1109_v46, %v982_v5  ;;  %v487_v5 = vld [vmem:[%s1599_s14 + $0x1d8] sm:$0xff]  ;;  %v488_v46 = vld [vmem:[%s1599_s14 + $0x1e0] sm:$0xff] }
 0x116   : > { %v999_v23 = vsel %vm615_vm11, %v487_v5, 0.0  ;;  %v1000_v24 = vsel %vm616_vm12, %v488_v46, 0.0  ;;  %vm631_vm11 = vcmp.lt.s32.totalorder %v2726_v63, 3000  ;;  %vm632_vm12 = vcmp.lt.s32.totalorder %v2727_v3, 3000  ;;  %v2742_v63 = vld [vmem:[#allocation13_spill] sm:$0xff]  ;;  %v2743_v3 = vld [vmem:[#allocation14_spill] sm:$0xff] }
 0x117   : > { %v1111_v45 = vadd.f32 %v1110_v50, %v983_v7  ;;  %v2756_v61 = vld [vmem:[#allocation27_spill] sm:$0xff] }
 0x119   : > { %v1112_v43 = vadd.f32 %v1111_v45, %v984_v8  ;;  %v490_v8 = vld [vmem:[%s1599_s14 + $0x1f0] sm:$0xff]  ;;  %v491_v45 = vld [vmem:[%s1599_s14 + $0x1f8] sm:$0xff] }
 0x11a   : > { %v1002_v26 = vsel %vm618_vm14, %v490_v8, 0.0  ;;  %v1003_v27 = vsel %vm619_vm15, %v491_v45, 0.0  ;;  %v509_v8 = vld [vmem:[%s1599_s14 + $0x288] sm:$0xff] }
 0x11b   : > { %v1113_v0 = vadd.f32 %v1112_v43, %v985_v9 }
 0x11d   : > { %v1114_v53 = vadd.f32 %v1113_v0, %v986_v10  ;;  %v493_v10 = vld [vmem:[%s1599_s14 + $0x208] sm:$0xff]  ;;  %v494_v0 = vld [vmem:[%s1599_s14 + $0x210] sm:$0xff] }
 0x11e   : > { %v1005_v29 = vsel %vm621_vm1, %v493_v10, 0.0  ;;  %v1006_v30 = vsel %vm622_vm2, %v494_v0, 0.0  ;;  %v2734_v10 = vld [vmem:[#allocation56_spill] sm:$0xff] }
 0x11f   : > { %v1115_v58 = vadd.f32 %v1114_v53, %v987_v11  ;;  %vm639_vm3 = vcmp.lt.s32.totalorder %v2734_v10, 3000  ;;  %v512_v0 = vld [vmem:[%s1599_s14 + $0x2a0] sm:$0xff]  ;;  %v2750_v10 = vld [vmem:[#allocation21_spill] sm:$0xff] }
 0x121   : > { %v1116_v60 = vadd.f32 %v1115_v58, %v988_v12  ;;  %v496_v12 = vld [vmem:[%s1599_s14 + $0x220] sm:$0xff]  ;;  %v497_v58 = vld [vmem:[%s1599_s14 + $0x228] sm:$0xff] }
 0x122   : > { %v1008_v32 = vsel %vm624_vm4, %v496_v12, 0.0  ;;  %v1009_v33 = vsel %vm625_vm5, %v497_v58, 0.0  ;;  %v2737_v58 = vld [vmem:[#allocation59_spill] sm:$0xff] }
 0x123   : > { %v1117_v62 = vadd.f32 %v1116_v60, %v989_v13  ;;  %vm642_vm6 = vcmp.lt.s32.totalorder %v2737_v58, 3000  ;;  %v2753_v58 = vld [vmem:[#allocation24_spill] sm:$0xff] }
 0x125   : > { %v1118_v48 = vadd.f32 %v1117_v62, %v990_v14  ;;  %v499_v14 = vld [vmem:[%s1599_s14 + $0x238] sm:$0xff]  ;;  %v500_v62 = vld [vmem:[%s1599_s14 + $0x240] sm:$0xff] }
 0x126   : > { %v1011_v35 = vsel %vm627_vm7, %v499_v14, 0.0  ;;  %v1012_v36 = vsel %vm628_vm8, %v500_v62, 0.0 }
 0x127   : > { %v1119_v2 = vadd.f32 %v1118_v48, %v991_v15 }
 0x129   : > { %v1120_v40 = vadd.f32 %v1119_v2, %v992_v16  ;;  %v502_v16 = vld [vmem:[%s1599_s14 + $0x250] sm:$0xff] }
 0x12a   : > { %v1014_v38 = vsel %vm630_vm10, %v502_v16, 0.0  ;;  %v518_v16 = vld [vmem:[%s1599_s14 + $0x2d0] sm:$0xff]  ;;  %vm646_vm10 = vcmp.lt.s32.totalorder %v2741_v54, 3000  ;;  %v2757_v54 = vld [vmem:[#allocation28_spill] sm:$0xff] }
 0x12b   : > { %v1121_v47 = vadd.f32 %v1120_v40, %v993_v17  ;;  %v503_v17 = vld [vmem:[%s1599_s14 + $0x258] sm:$0xff] }
 0x12c   : > { %v1015_v39 = vsel %vm631_vm11, %v503_v17, 0.0  ;;  %v519_v17 = vld [vmem:[%s1599_s14 + $0x2d8] sm:$0xff]  ;;  %vm647_vm11 = vcmp.lt.s32.totalorder %v2742_v63, 3000  ;;  %v2758_v63 = vld [vmem:[#allocation29_spill] sm:$0xff] }
 0x12d   : > { %v1122_v4 = vadd.f32 %v1121_v47, %v994_v18  ;;  %v504_v18 = vld [vmem:[%s1599_s14 + $0x260] sm:$0xff] }
 0x12f   : > { %v1123_v6 = vadd.f32 %v1122_v4, %v995_v19  ;;  %v505_v19 = vld [vmem:[%s1599_s14 + $0x268] sm:$0xff] }
 0x130   : > { %v1017_v5 = vsel %vm633_vm13, %v505_v19, 0.0  ;;  %v521_v19 = vld [vmem:[%s1599_s14 + $0x2e8] sm:$0xff]  ;;  %vm649_vm13 = vcmp.lt.s32.totalorder %v2744_v41, 3000  ;;  %v2760_v41 = vld [vmem:[#allocation31_spill] sm:$0xff] }
 0x131   : > { %v1124_v51 = vadd.f32 %v1123_v6, %v996_v20  ;;  %v1016_v20 = vsel %vm632_vm12, %v504_v18, 0.0  ;;  %v2729_v6 = vld [vmem:[#allocation51_spill] sm:$0xff]  ;;  %v520_v18 = vld [vmem:[%s1599_s14 + $0x2e0] sm:$0xff]  ;;  %vm648_vm12 = vcmp.lt.s32.totalorder %v2743_v3, 3000  ;;  %v2759_v3 = vld [vmem:[#allocation30_spill] sm:$0xff] }
 0x132   : > { %vm634_vm14 = vcmp.lt.s32.totalorder %v2729_v6, 3000  ;;  %v2745_v6 = vld [vmem:[#allocation16_spill] sm:$0xff] }
 0x133   : > { %v1125_v7 = vadd.f32 %v1124_v51, %v997_v21  ;;  %v507_v51 = vld [vmem:[%s1599_s14 + $0x278] sm:$0xff] }
 0x135   : > { %v1126_v50 = vadd.f32 %v1125_v7, %v998_v22  ;;  %v2730_v22 = vld [vmem:[#allocation52_spill] sm:$0xff]  ;;  %v1018_v7 = vsel %vm634_vm14, %v506_v49, 0.0  ;;  %v522_v49 = vld [vmem:[%s1599_s14 + $0x2f0] sm:$0xff]  ;;  %vm650_vm14 = vcmp.lt.s32.totalorder %v2745_v6, 3000 }
 0x136   : > { %vm635_vm15 = vcmp.lt.s32.totalorder %v2730_v22, 3000  ;;  %v2746_v22 = vld [vmem:[#allocation17_spill] sm:$0xff]  ;;  %v2761_v6 = vld [vmem:[#allocation32_spill] sm:$0xff] }
 0x137   : > { %v1127_v56 = vadd.f32 %v1126_v50, %v999_v23  ;;  %v508_v23 = vld [vmem:[%s1599_s14 + $0x280] sm:$0xff] }
 0x138   : > { %v1020_v45 = vsel %vm636_vm0, %v508_v23, 0.0  ;;  %v524_v23 = vld [vmem:[%s1599_s14 + $0x300] sm:$0xff]  ;;  %vm652_vm0 = vcmp.lt.s32.totalorder %v2747_v44, 3000  ;;  %v2763_v44 = vld [vmem:[#allocation34_spill] sm:$0xff] }
 0x139   : > { %v1128_v9 = vadd.f32 %v1127_v56, %v1000_v24  ;;  %v1019_v24 = vsel %vm635_vm15, %v507_v51, 0.0  ;;  %v2732_v56 = vld [vmem:[#allocation54_spill] sm:$0xff]  ;;  %v523_v51 = vld [vmem:[%s1599_s14 + $0x2f8] sm:$0xff]  ;;  %vm651_vm15 = vcmp.lt.s32.totalorder %v2746_v22, 3000  ;;  %v2762_v22 = vld [vmem:[#allocation33_spill] sm:$0xff] }
 0x13a   : > { %vm637_vm1 = vcmp.lt.s32.totalorder %v2732_v56, 3000  ;;  %v2748_v56 = vld [vmem:[#allocation19_spill] sm:$0xff] }
 0x13b   : > { %v1129_v43 = vadd.f32 %v1128_v9, %v1001_v25  ;;  %v510_v9 = vld [vmem:[%s1599_s14 + $0x290] sm:$0xff] }
 0x13d   : > { %v1130_v57 = vadd.f32 %v1129_v43, %v1002_v26  ;;  %v2733_v26 = vld [vmem:[#allocation55_spill] sm:$0xff]  ;;  %v1021_v43 = vsel %vm637_vm1, %v509_v8, 0.0  ;;  %v525_v8 = vld [vmem:[%s1599_s14 + $0x308] sm:$0xff]  ;;  %vm653_vm1 = vcmp.lt.s32.totalorder %v2748_v56, 3000 }
 0x13e   : > { %vm638_vm2 = vcmp.lt.s32.totalorder %v2733_v26, 3000  ;;  %v2749_v26 = vld [vmem:[#allocation20_spill] sm:$0xff]  ;;  %v2764_v56 = vld [vmem:[#allocation35_spill] sm:$0xff] }
 0x13f   : > { %v1131_v11 = vadd.f32 %v1130_v57, %v1003_v27  ;;  %v511_v27 = vld [vmem:[%s1599_s14 + $0x298] sm:$0xff] }
 0x140   : > { %v1023_v52 = vsel %vm639_vm3, %v511_v27, 0.0  ;;  %v527_v27 = vld [vmem:[%s1599_s14 + $0x318] sm:$0xff]  ;;  %vm655_vm3 = vcmp.lt.s32.totalorder %v2750_v10, 3000  ;;  %v2766_v10 = vld [vmem:[#allocation37_spill] sm:$0xff] }
 0x141   : > { %v1132_v53 = vadd.f32 %v1131_v11, %v1004_v28  ;;  %v1022_v28 = vsel %vm638_vm2, %v510_v9, 0.0  ;;  %v2735_v11 = vld [vmem:[#allocation57_spill] sm:$0xff]  ;;  %v526_v9 = vld [vmem:[%s1599_s14 + $0x310] sm:$0xff]  ;;  %vm654_vm2 = vcmp.lt.s32.totalorder %v2749_v26, 3000  ;;  %v2765_v26 = vld [vmem:[#allocation36_spill] sm:$0xff] }
 0x142   : > { %vm640_vm4 = vcmp.lt.s32.totalorder %v2735_v11, 3000  ;;  %v2751_v11 = vld [vmem:[#allocation22_spill] sm:$0xff] }
 0x143   : > { %v1133_v1 = vadd.f32 %v1132_v53, %v1005_v29  ;;  %v513_v53 = vld [vmem:[%s1599_s14 + $0x2a8] sm:$0xff] }
 0x145   : > { %v1134_v13 = vadd.f32 %v1133_v1, %v1006_v30  ;;  %v2736_v30 = vld [vmem:[#allocation58_spill] sm:$0xff]  ;;  %v1024_v1 = vsel %vm640_vm4, %v512_v0, 0.0  ;;  %v528_v0 = vld [vmem:[%s1599_s14 + $0x320] sm:$0xff]  ;;  %vm656_vm4 = vcmp.lt.s32.totalorder %v2751_v11, 3000 }
 0x146   : > { %vm641_vm5 = vcmp.lt.s32.totalorder %v2736_v30, 3000  ;;  %v2752_v30 = vld [vmem:[#allocation23_spill] sm:$0xff]  ;;  %v2767_v11 = vld [vmem:[#allocation38_spill] sm:$0xff] }
 0x147   : > { %v1135_v60 = vadd.f32 %v1134_v13, %v1007_v31  ;;  %v514_v31 = vld [vmem:[%s1599_s14 + $0x2b0] sm:$0xff] }
 0x148   : > { %v1026_v14 = vsel %vm642_vm6, %v514_v31, 0.0  ;;  %v530_v31 = vld [vmem:[%s1599_s14 + $0x330] sm:$0xff]  ;;  %vm658_vm6 = vcmp.lt.s32.totalorder %v2753_v58, 3000  ;;  %v2769_v58 = vld [vmem:[#allocation40_spill] sm:$0xff] }
 0x149   : > { %v1136_v55 = vadd.f32 %v1135_v60, %v1008_v32  ;;  %v1025_v32 = vsel %vm641_vm5, %v513_v53, 0.0  ;;  %v2738_v60 = vld [vmem:[#allocation60_spill] sm:$0xff]  ;;  %v529_v53 = vld [vmem:[%s1599_s14 + $0x328] sm:$0xff]  ;;  %vm657_vm5 = vcmp.lt.s32.totalorder %v2752_v30, 3000  ;;  %v2768_v30 = vld [vmem:[#allocation39_spill] sm:$0xff] }
 0x14a   : > { %vm643_vm7 = vcmp.lt.s32.totalorder %v2738_v60, 3000  ;;  %v2754_v60 = vld [vmem:[#allocation25_spill] sm:$0xff] }
 0x14b   : > { %v1137_v15 = vadd.f32 %v1136_v55, %v1009_v33  ;;  %v516_v55 = vld [vmem:[%s1599_s14 + $0x2c0] sm:$0xff] }
 0x14d   : > { %v1138_v48 = vadd.f32 %v1137_v15, %v1010_v34  ;;  %v2739_v34 = vld [vmem:[#allocation10_spill] sm:$0xff]  ;;  %v1027_v15 = vsel %vm643_vm7, %v515_v42, 0.0  ;;  %v531_v42 = vld [vmem:[%s1599_s14 + $0x338] sm:$0xff]  ;;  %vm659_vm7 = vcmp.lt.s32.totalorder %v2754_v60, 3000  ;;  %v2770_v60 = vld [vmem:[#allocation41_spill] sm:$0xff] }
 0x14e   : > { %vm644_vm8 = vcmp.lt.s32.totalorder %v2739_v34, 3000  ;;  %v2755_v34 = vld [vmem:[#allocation26_spill] sm:$0xff] }
 0x14f   : > { %v1139_v2 = vadd.f32 %v1138_v48, %v1011_v35  ;;  %v517_v35 = vld [vmem:[%s1599_s14 + $0x2c8] sm:$0xff] }
 0x151   : > { %v1140_v40 = vadd.f32 %v1139_v2, %v1012_v36  ;;  %v1028_v36 = vsel %vm644_vm8, %v516_v55, 0.0  ;;  %v532_v55 = vld [vmem:[%s1599_s14 + $0x340] sm:$0xff]  ;;  %vm660_vm8 = vcmp.lt.s32.totalorder %v2755_v34, 3000  ;;  %v2771_v34 = vld [vmem:[#allocation42_spill] sm:$0xff] }
 0x153   : > { %v1141_v47 = vadd.f32 %v1140_v40, %v1013_v37  ;;  %v1029_v37 = vsel %vm645_vm9, %v517_v35, 0.0  ;;  %v533_v35 = vld [vmem:[%s1599_s14 + $0x348] sm:$0xff]  ;;  %vm661_vm9 = vcmp.lt.s32.totalorder %v2756_v61, 3000  ;;  %v2772_v61 = vld [vmem:[#allocation43_spill] sm:$0xff] }
 0x155   : > { %v1142_v4 = vadd.f32 %v1141_v47, %v1014_v38  ;;  %v1030_v38 = vsel %vm646_vm10, %v518_v16, 0.0  ;;  %v534_v16 = vld [vmem:[%s1599_s14 + $0x350] sm:$0xff]  ;;  %vm662_vm10 = vcmp.lt.s32.totalorder %v2757_v54, 3000  ;;  %v2773_v54 = vld [vmem:[#allocation44_spill] sm:$0xff] }
 0x157   : > { %v1143_v21 = vadd.f32 %v1142_v4, %v1015_v39  ;;  %v1031_v39 = vsel %vm647_vm11, %v519_v17, 0.0  ;;  %v535_v17 = vld [vmem:[%s1599_s14 + $0x358] sm:$0xff]  ;;  %vm663_vm11 = vcmp.lt.s32.totalorder %v2758_v63, 3000  ;;  %v2774_v63 = vld [vmem:[#allocation61_spill] sm:$0xff] }
 0x159   : > { %v1144_v46 = vadd.f32 %v1143_v21, %v1016_v20  ;;  %v1032_v20 = vsel %vm648_vm12, %v520_v18, 0.0  ;;  %v536_v18 = vld [vmem:[%s1599_s14 + $0x360] sm:$0xff]  ;;  %vm664_vm12 = vcmp.lt.s32.totalorder %v2759_v3, 3000  ;;  %v2775_v3 = vld [vmem:[#allocation45_spill] sm:$0xff] }
 0x15b   : > { %v1145_v50 = vadd.f32 %v1144_v46, %v1017_v5  ;;  %v1033_v5 = vsel %vm649_vm13, %v521_v19, 0.0  ;;  %v537_v19 = vld [vmem:[%s1599_s14 + $0x368] sm:$0xff]  ;;  %vm665_vm13 = vcmp.lt.s32.totalorder %v2760_v41, 3000  ;;  %v2776_v41 = vld [vmem:[#allocation46_spill] sm:$0xff] }
 0x15d   : > { %v1146_v25 = vadd.f32 %v1145_v50, %v1018_v7  ;;  %v1034_v7 = vsel %vm650_vm14, %v522_v49, 0.0  ;;  %v538_v49 = vld [vmem:[%s1599_s14 + $0x370] sm:$0xff]  ;;  %vm666_vm14 = vcmp.lt.s32.totalorder %v2761_v6, 3000 }
 0x15e   : > { %v2777_v6 = vld [vmem:[#allocation62_spill] sm:$0xff] }
 0x15f   : > { %v1147_v59 = vadd.f32 %v1146_v25, %v1019_v24  ;;  %v1035_v24 = vsel %vm651_vm15, %v523_v51, 0.0  ;;  %v539_v51 = vld [vmem:[%s1599_s14 + $0x378] sm:$0xff]  ;;  %vm667_vm15 = vcmp.lt.s32.totalorder %v2762_v22, 3000 }
 0x160   : > { %v2778_v22 = vld [vmem:[#allocation63_spill] sm:$0xff] }
 0x161   : > { %v1148_v57 = vadd.f32 %v1147_v59, %v1020_v45  ;;  %v1036_v45 = vsel %vm652_vm0, %v524_v23, 0.0  ;;  %v540_v23 = vld [vmem:[%s1599_s14 + $0x380] sm:$0xff]  ;;  %vm668_vm0 = vcmp.lt.s32.totalorder %v2763_v44, 3000 }
 0x163   : > { %v1149_v29 = vadd.f32 %v1148_v57, %v1021_v43  ;;  %v1037_v43 = vsel %vm653_vm1, %v525_v8, 0.0  ;;  %v541_v8 = vld [vmem:[%s1599_s14 + $0x388] sm:$0xff]  ;;  %vm669_vm1 = vcmp.lt.s32.totalorder %v2764_v56, 3000 }
 0x165   : > { %v1150_v12 = vadd.f32 %v1149_v29, %v1022_v28  ;;  %v1038_v28 = vsel %vm654_vm2, %v526_v9, 0.0  ;;  %v542_v9 = vld [vmem:[%s1599_s14 + $0x390] sm:$0xff]  ;;  %vm670_vm2 = vcmp.lt.s32.totalorder %v2765_v26, 3000  ;;  %v1068_v26 = vld [vmem:[#allocation2] sm:$0x1] }
 0x167   : > { %v1151_v13 = vadd.f32 %v1150_v12, %v1023_v52  ;;  %v1039_v52 = vsel %vm655_vm3, %v527_v27, 0.0  ;;  %v543_v27 = vld [vmem:[%s1599_s14 + $0x398] sm:$0xff]  ;;  %vm671_vm3 = vcmp.lt.s32.totalorder %v2766_v10, 3000 }
 0x169   : > { %v1152_v33 = vadd.f32 %v1151_v13, %v1024_v1  ;;  %v1040_v1 = vsel %vm656_vm4, %v528_v0, 0.0  ;;  %v544_v0 = vld [vmem:[%s1599_s14 + $0x3a0] sm:$0xff]  ;;  %vm672_vm4 = vcmp.lt.s32.totalorder %v2767_v11, 3000 }
 0x16b   : > { %v1153_v62 = vadd.f32 %v1152_v33, %v1025_v32  ;;  %v1041_v32 = vsel %vm657_vm5, %v529_v53, 0.0  ;;  %v545_v53 = vld [vmem:[%s1599_s14 + $0x3a8] sm:$0xff]  ;;  %vm673_vm5 = vcmp.lt.s32.totalorder %v2768_v30, 3000 }
 0x16d   : > { %v1154_v48 = vadd.f32 %v1153_v62, %v1026_v14  ;;  %v1042_v14 = vsel %vm658_vm6, %v530_v31, 0.0  ;;  %v546_v31 = vld [vmem:[%s1599_s14 + $0x3b0] sm:$0xff]  ;;  %vm674_vm6 = vcmp.lt.s32.totalorder %v2769_v58, 3000 }
 0x16f   : > { %v1155_v2 = vadd.f32 %v1154_v48, %v1027_v15  ;;  %v1043_v15 = vsel %vm659_vm7, %v531_v42, 0.0  ;;  %v547_v42 = vld [vmem:[%s1599_s14 + $0x3b8] sm:$0xff]  ;;  %vm675_vm7 = vcmp.lt.s32.totalorder %v2770_v60, 3000 }
 0x171   : > { %v1156_v40 = vadd.f32 %v1155_v2, %v1028_v36  ;;  %v1044_v36 = vsel %vm660_vm8, %v532_v55, 0.0  ;;  %v548_v55 = vld [vmem:[%s1599_s14 + $0x3c0] sm:$0xff]  ;;  %vm676_vm8 = vcmp.lt.s32.totalorder %v2771_v34, 3000 }
 0x173   : > { %v1157_v47 = vadd.f32 %v1156_v40, %v1029_v37  ;;  %v1045_v37 = vsel %vm661_vm9, %v533_v35, 0.0  ;;  %v549_v35 = vld [vmem:[%s1599_s14 + $0x3c8] sm:$0xff]  ;;  %vm677_vm9 = vcmp.lt.s32.totalorder %v2772_v61, 3000 }
 0x175   : > { %v1158_v4 = vadd.f32 %v1157_v47, %v1030_v38  ;;  %v1046_v38 = vsel %vm662_vm10, %v534_v16, 0.0  ;;  %v550_v16 = vld [vmem:[%s1599_s14 + $0x3d0] sm:$0xff]  ;;  %vm678_vm10 = vcmp.lt.s32.totalorder %v2773_v54, 3000 }
 0x177   : > { %v1159_v21 = vadd.f32 %v1158_v4, %v1031_v39  ;;  %v1047_v39 = vsel %vm663_vm11, %v535_v17, 0.0  ;;  %v551_v17 = vld [vmem:[%s1599_s14 + $0x3d8] sm:$0xff]  ;;  %vm679_vm11 = vcmp.lt.s32.totalorder %v2774_v63, 3000 }
 0x179   : > { %v1160_v46 = vadd.f32 %v1159_v21, %v1032_v20  ;;  %v1048_v20 = vsel %vm664_vm12, %v536_v18, 0.0  ;;  %v552_v18 = vld [vmem:[%s1599_s14 + $0x3e0] sm:$0xff]  ;;  %vm680_vm12 = vcmp.lt.s32.totalorder %v2775_v3, 3000 }
 0x17b   : > { %v1161_v50 = vadd.f32 %v1160_v46, %v1033_v5  ;;  %v1049_v5 = vsel %vm665_vm13, %v537_v19, 0.0  ;;  %v553_v19 = vld [vmem:[%s1599_s14 + $0x3e8] sm:$0xff]  ;;  %vm681_vm13 = vcmp.lt.s32.totalorder %v2776_v41, 3000 }
 0x17d   : > { %v1162_v25 = vadd.f32 %v1161_v50, %v1034_v7  ;;  %v1050_v7 = vsel %vm666_vm14, %v538_v49, 0.0  ;;  %v554_v49 = vld [vmem:[%s1599_s14 + $0x3f0] sm:$0xff]  ;;  %vm682_vm14 = vcmp.lt.s32.totalorder %v2777_v6, 3000 }
 0x17f   : > { %v1163_v59 = vadd.f32 %v1162_v25, %v1035_v24  ;;  %v1051_v24 = vsel %vm667_vm15, %v539_v51, 0.0  ;;  %v555_v51 = vld [vmem:[%s1599_s14 + $0x3f8] sm:$0xff]  ;;  %vm683_vm15 = vcmp.lt.s32.totalorder %v2778_v22, 3000 }
 0x180   : > { %v1067_v44 = vsel %vm683_vm15, %v555_v51, 0.0 }
 0x181   : > { %v1164_v57 = vadd.f32 %v1163_v59, %v1036_v45  ;;  %v1052_v45 = vsel %vm668_vm0, %v540_v23, 0.0 }
 0x183   : > { %v1165_v29 = vadd.f32 %v1164_v57, %v1037_v43  ;;  %v1053_v43 = vsel %vm669_vm1, %v541_v8, 0.0 }
 0x185   : > { %v1166_v12 = vadd.f32 %v1165_v29, %v1038_v28  ;;  %v1054_v28 = vsel %vm670_vm2, %v542_v9, 0.0 }
 0x187   : > { %v1167_v13 = vadd.f32 %v1166_v12, %v1039_v52  ;;  %v1055_v52 = vsel %vm671_vm3, %v543_v27, 0.0 }
 0x189   : > { %v1168_v33 = vadd.f32 %v1167_v13, %v1040_v1  ;;  %v1056_v1 = vsel %vm672_vm4, %v544_v0, 0.0 }
 0x18b   : > { %v1169_v62 = vadd.f32 %v1168_v33, %v1041_v32  ;;  %v1057_v32 = vsel %vm673_vm5, %v545_v53, 0.0 }
 0x18d   : > { %v1170_v48 = vadd.f32 %v1169_v62, %v1042_v14  ;;  %v1058_v14 = vsel %vm674_vm6, %v546_v31, 0.0 }
 0x18f   : > { %v1171_v2 = vadd.f32 %v1170_v48, %v1043_v15  ;;  %v1059_v15 = vsel %vm675_vm7, %v547_v42, 0.0 }
 0x191   : > { %v1172_v40 = vadd.f32 %v1171_v2, %v1044_v36  ;;  %v1060_v36 = vsel %vm676_vm8, %v548_v55, 0.0 }
 0x193   : > { %v1173_v47 = vadd.f32 %v1172_v40, %v1045_v37  ;;  %v1061_v37 = vsel %vm677_vm9, %v549_v35, 0.0 }
 0x195   : > { %v1174_v4 = vadd.f32 %v1173_v47, %v1046_v38  ;;  %v1062_v38 = vsel %vm678_vm10, %v550_v16, 0.0 }
 0x197   : > { %v1175_v21 = vadd.f32 %v1174_v4, %v1047_v39  ;;  %v1063_v39 = vsel %vm679_vm11, %v551_v17, 0.0 }
 0x199   : > { %v1176_v46 = vadd.f32 %v1175_v21, %v1048_v20  ;;  %v1064_v20 = vsel %vm680_vm12, %v552_v18, 0.0 }
 0x19b   : > { %v1177_v50 = vadd.f32 %v1176_v46, %v1049_v5  ;;  %v1065_v5 = vsel %vm681_vm13, %v553_v19, 0.0 }
 0x19d   : > { %v1178_v25 = vadd.f32 %v1177_v50, %v1050_v7  ;;  %v1066_v7 = vsel %vm682_vm14, %v554_v49, 0.0 }
 0x19f   : > { %v1179_v59 = vadd.f32 %v1178_v25, %v1051_v24 }
 0x1a1   : > { %v1180_v57 = vadd.f32 %v1179_v59, %v1052_v45 }
 0x1a3   : > { %v1181_v29 = vadd.f32 %v1180_v57, %v1053_v43 }
 0x1a5   : > { %v1182_v12 = vadd.f32 %v1181_v29, %v1054_v28 }
 0x1a7   : > { %v1183_v13 = vadd.f32 %v1182_v12, %v1055_v52 }
 0x1a9   : > { %v1184_v33 = vadd.f32 %v1183_v13, %v1056_v1 }
 0x1ab   : > { %v1185_v62 = vadd.f32 %v1184_v33, %v1057_v32 }
 0x1ad   : > { %v1186_v48 = vadd.f32 %v1185_v62, %v1058_v14 }
 0x1af   : > { %v1187_v2 = vadd.f32 %v1186_v48, %v1059_v15 }
 0x1b1   : > { %v1188_v40 = vadd.f32 %v1187_v2, %v1060_v36 }
 0x1b3   : > { %v1189_v47 = vadd.f32 %v1188_v40, %v1061_v37 }
 0x1b5   : > { %v1190_v4 = vadd.f32 %v1189_v47, %v1062_v38 }
 0x1b7   : > { %v1191_v21 = vadd.f32 %v1190_v4, %v1063_v39 }
 0x1b9   : > { %v1192_v46 = vadd.f32 %v1191_v21, %v1064_v20 }
 0x1bb   : > { %v1193_v23 = vadd.f32 %v1192_v46, %v1065_v5 }
 0x1bd   : > { %v1194_v50 = vadd.f32 %v1193_v23, %v1066_v7 }
 0x1bf   : > { %v1195_v24 = vadd.f32 %v1194_v50, %v1067_v44 }
 0x1c1   : > { %v1196_v8 = vrot.slane %v1195_v24, 4 }
 0x1c3   : > { %v1197_v56 = vadd.f32 %v1196_v8, %v1195_v24 }
 0x1c5   : > { %v1198_v25 = vrot.slane %v1197_v56, 2 }
 0x1c7   : > { %v1199_v45 = vadd.f32 %v1198_v25, %v1197_v56 }
 0x1c9   : > { %v1200_v9 = vrot.slane %v1199_v45, 1 }
 0x1cb   : > { %v1201_v59 = vadd.f32 %v1200_v9, %v1199_v45  ;;  %1207 = sbr.rel (%p1301_p7) target bundleno = 472 (0x1d8), region = 36 }
 0x1cd   : > { %v1202_v43 = vadd.f32 %v1201_v59, %v1068_v26 }
 0x1cf   : > { %1203 = vst [vmem:[#allocation2] sm:$0x1] %v1202_v43 }
 0x1d6   : > { %v1366_v27 = vld [vmem:[#allocation2] ss:$0 sm:$0xff] }
 0x1d7   : > { %1212 = vst [vmem:[#allocation6] sm:$0xff] %v1366_v27 }
 0x1d8 PF: > { %p1312_p12 = scmp.eq.s32.totalorder %s1287_s12, 2  ;;  %s1223_s27 = sshll.u32 %s2590_s1, 4  ;;  %s1224_s27 = int_to_ptr.hbm [resolvable:$true] %s1223_s27 }
 0x1d9   : > { %s1494_s3 = smov [#allocation6]  }
 0x1da   : > { %s1221_s4 = sshll.u32 %s1494_s3, 4  ;;  %s1222_s4 = int_to_ptr.vmem [resolvable:$true] %s1221_s4 }
 0x1db   : > { %1309 = dma.vmem_to_hbm [thread:$0]  (%p1312_p12), %s1222_s4, 128, %s1224_s27, [#allocation5]  }
 0x1dc   : > { %1463 = dma.done.wait (%p1312_p12), [#allocation5], 128  }
 0x1dd   : > { %1465 = vsyncadd (%p1312_p12), [#allocation5], 4294967168 }
 0x1de PF: > { %s15_s11 = sadd.s32 1, %s1488_s11   ;;  %s2779_s6 = smov %s1472_s7 }
 0x1df   : > { %p12_p13 = scmp.ge.s32.totalorder %s15_s11, 5   ;;  %s2780_s7 = smov %s1476_s8 }
 0x1e0   : > { %s2781_s8 = smov %s1551_s17  ;;  %s2782_s9 = smov %s1484_s10 }
 0x1e1   : > { %s2783_s10 = smov %s2785_s13  ;;  %14 = sbr.rel (!%p12_p13) target bundleno = 5 (0x5), region = 70 }
 0x1e6   :  { %1237 = vsyncpa [#allocation4], 1 }
 0x1e7   :  { %1239 = vsyncpa [#allocation4 + $0x1], 1 }
 0x1e8   :  { %1240 = vsyncpa [#allocation5], 1 }
 0x1e9   :  { %1242 = vsyncpa [#allocation5 + $0x1], 1 }

</bundles_post_ra>
